<compile_context>
chip_gen: v5e
topology: v5e:2x2
jax: 0.10.0
libtpu: 0.0.40
codegen_flags: <defaults>
</compile_context>

<pallas_src>
import math

import jax
import jax.numpy as jnp
import numpy as np
from jax import lax
from jax.experimental import pallas as pl
from jax.experimental.pallas import tpu as pltpu


_INT32_SIGN = -2147483648  # 0x80000000 as a two's-complement int32 (Python int)


def _make_kwinner_kernel(k, use_factor, use_peel):
    """Builds the Pallas kernel for one (tr, N) row tile.

    k / use_factor / use_peel are static Python values.  No array constants
    are created outside the kernel body (Pallas rejects captured constants).
    """

    def kernel(*refs):
        if use_factor:
            x_ref, f_ref, o_ref = refs
        else:
            x_ref, o_ref = refs

        xf = x_ref[...].astype(jnp.float32)              # (tr, N)
        xp = xf * f_ref[...] if use_factor else xf       # boosted values

        if use_peel:
            # Small-k fast path: tie-counting max peel, fully unrolled
            # (k <= 8 keeps code size / live ranges tiny).  Each step removes
            # ALL occurrences of the current row max; the k-th sorted value is
            # the max at the step where the running count crosses k (matches
            # torch.topk "ties at threshold all pass" semantics).
            w = xp
            count = jnp.zeros(xp.shape[:-1] + (1,), jnp.float32)
            thr = jnp.full(xp.shape[:-1] + (1,), -jnp.inf, jnp.float32)
            for _ in range(k):
                cur_max = jnp.max(w, axis=-1, keepdims=True)
                is_max = w == cur_max
                cnt = jnp.sum(is_max.astype(jnp.float32), axis=-1, keepdims=True)
                new_count = count + cnt
                hit = jnp.logical_and(count < k, new_count >= k)
                thr = jnp.where(hit, cur_max, thr)
                w = jnp.where(is_max, -jnp.inf, w)
                count = new_count
            mask = xp >= thr                              # float compare, like torch
        else:
            # Bit-exact threshold search: map f32 -> order-preserving int32 key
            # (sign-flip trick), then build the k-th largest key bit by bit in
            # the "biased" (unsigned-ordered) domain.  Fixed 32 iterations:
            # one VPU compare + one XLU count per iteration, independent of k.
            i32 = lax.bitcast_convert_type(xp, jnp.int32)
            skey = i32 ^ (jnp.right_shift(i32, 31) & 0x7FFFFFFF)
            thr_b = jnp.zeros(skey.shape[:-1] + (1,), jnp.int32)  # biased thr
            for bit in range(31, -1, -1):                 # static, fully unrolled
                m = 1 << bit
                if m >= 2 ** 31:                          # wrap to int32 value
                    m -= 2 ** 32
                cand_b = thr_b | m
                cand_s = cand_b ^ _INT32_SIGN             # biased -> signed key
                cnt = jnp.sum((skey >= cand_s).astype(jnp.int32),
                              axis=-1, keepdims=True)
                thr_b = jnp.where(cnt >= k, cand_b, thr_b)
            thr_s = thr_b ^ _INT32_SIGN                   # k-th largest key
            mask = skey >= thr_s

        # Re-read x from VMEM for the select (nothing extra kept live across
        # the search) and use where() instead of x * mask (no NaNs from inf*0).
        o_ref[...] = jnp.where(mask, x_ref[...], 0).astype(o_ref.dtype)

    return kernel


def _vmem_budget_bytes():
    """(row-tile working-set budget, Mosaic scoped-VMEM limit) for this chip."""
    cap = 64 * 1024 * 1024                    # conservative fallback (v7x-sized)
    try:
        cap = int(pltpu.get_tpu_info().vmem_capacity_bytes) or cap
    except Exception:
        pass
    cap = max(cap, 16 * 1024 * 1024)
    vmem_limit = int(cap * 0.7)               # scoped limit handed to Mosaic
    budget = int(vmem_limit * 0.6)            # what the tile picker may consume
    return budget, vmem_limit


def _pick_row_tile(R, C, N, itemsize, use_factor, budget):
    """Row tile: multiple of lcm(C, sublane granule) (factor alignment +
    (8,128) block rule), sized to the VMEM budget, keeping several grid steps
    so DMA of tile i+1 hides under compute of tile i and the parallel axis can
    shard across TensorCores (v7x megacore)."""
    sub = {4: 8, 2: 16, 1: 32}.get(itemsize, 8)
    unit = C * sub // math.gcd(C, sub)
    if R <= unit:
        return R                               # single full-dim block
    # per-row VMEM bytes: double-buffered x & out blocks, factor block, and the
    # f32/i32 in-kernel temporaries (xp / keys / compare pass).
    per_row = N * (4 * itemsize + (8 if use_factor else 0) + 16)
    budget_rows = max(unit, (budget // per_row) // unit * unit)
    rows_per_step = -(-R // 8)                 # aim for ~8 grid steps
    step_rows = -(-rows_per_step // unit) * unit
    tr = min(budget_rows, step_rows)
    if tr >= R:                                # force >= 2 grid steps
        tr = max(unit, (R // 2) // unit * unit)
    return min(tr, R)


class KWinnerLayer2D:
    """JAX/Pallas port of the PyTorch KWinnerLayer2D forward pass."""

    def __init__(self, input_shape, channels, density, boost_factor=0):
        self.density = float(density)
        self.boost_factor = float(boost_factor)
        self.channels = int(channels)
        self.input_shape = tuple(input_shape)
        # nn.Parameter(torch.zeros([channels] + list(input_shape)), requires_grad=False)
        self.active_average = jnp.zeros((self.channels,) + self.input_shape,
                                        jnp.float32)
        # TODO(synk): training-time running update of active_average
        # ((1 - B/1000) * avg + mask.sum(0)/1000) is stateful bookkeeping
        # outside the forward hot path; not implemented.

    def __call__(self, x):
        B, C, H, W = x.shape
        N = H * W
        k = int(self.density * N)
        # torch.topk would error for k == 0 or k > N; clamp to a valid range.
        k = max(1, min(k, N))
        use_factor = self.boost_factor != 0
        use_peel = k <= 8                      # peel ~2k reduces vs ~32 for bisection

        R = B * C
        x2 = x.reshape(R, N)                   # pack (batch, channel) on sublanes
        itemsize = jnp.dtype(x.dtype).itemsize
        budget, vmem_limit = _vmem_budget_bytes()
        tr = _pick_row_tile(R, C, N, itemsize, use_factor, budget)
        # Non-divisible R: last block reads some out-of-bounds rows (harmless,
        # per-row math) and Pallas masks the out-of-bounds output writes.
        grid = (pl.cdiv(R, tr),)

        args = [x2]
        in_specs = [pl.BlockSpec((tr, N), lambda i: (i, 0))]
        if use_factor:
            factor = jnp.exp((self.density - self.active_average)
                             * self.boost_factor)         # (C, H, W)
            # Pre-tile the (C, N) factor to the row tile (tr % C == 0) so it
            # broadcasts with plain elementwise ops in-kernel; constant block
            # index -> stays resident across grid steps.
            f2 = factor.reshape(C, N).astype(jnp.float32)
            f_tile = jnp.tile(f2, (tr // C, 1))            # (tr, N)
            args.append(f_tile)
            in_specs.append(pl.BlockSpec((tr, N), lambda i: (0, 0)))

        kernel = _make_kwinner_kernel(k, use_factor, use_peel)

        iters = k if use_peel else 32
        flops = int(R) * int(N) * (4 * iters + 8)
        bytes_accessed = 2 * R * N * itemsize + (tr * N * 4 if use_factor else 0)

        out = pl.pallas_call(
            kernel,
            out_shape=jax.ShapeDtypeStruct((R, N), x.dtype),
            grid=grid,
            in_specs=in_specs,
            out_specs=pl.BlockSpec((tr, N), lambda i: (i, 0)),
            compiler_params=pltpu.CompilerParams(
                dimension_semantics=("parallel",),
                vmem_limit_bytes=int(vmem_limit)),
            cost_estimate=pl.CostEstimate(flops=int(flops), transcendentals=0,
                                          bytes_accessed=int(bytes_accessed)),
        )(*args)
        return out.reshape(B, C, H, W)


def _reference(x, density, factor=None):
    """Pure-JAX reference matching k_winners2d.forward (PyTorch)."""
    B, C, H, W = x.shape
    k = max(1, min(int(density * H * W), H * W))
    xp = x if factor is None else x * factor
    v = -jnp.sort(-(xp.reshape(B, C, -1)), axis=-1)[:, :, :k]
    thr = v[:, :, k - 1].reshape(B, C, 1, 1)
    mask = (xp >= thr).astype(x.dtype)
    return x * mask


if __name__ == "__main__":
    key = jax.random.PRNGKey(0)
    kx, ka, kx2, ka2 = jax.random.split(key, 4)

    # Case 1: boosted, bisection path (k = 25), B*C = 8 rows -> single tile.
    B, C, H, W = 2, 4, 16, 16
    density, boost = 0.1, 1.5
    x = jax.random.normal(kx, (B, C, H, W), dtype=jnp.float32)
    layer = KWinnerLayer2D((H, W), C, density, boost_factor=boost)
    layer.active_average = jax.random.uniform(ka, (C, H, W), jnp.float32,
                                              minval=0.0, maxval=0.3)
    out = jax.block_until_ready(layer(x))
    factor = jnp.exp((density - layer.active_average) * boost)
    np.testing.assert_allclose(np.asarray(out),
                               np.asarray(_reference(x, density, factor)),
                               rtol=1e-6, atol=1e-6)

    # Case 2: un-boosted, bisection path (specialized kernel, no factor input).
    layer0 = KWinnerLayer2D((H, W), C, density, boost_factor=0)
    out0 = jax.block_until_ready(layer0(x))
    np.testing.assert_allclose(np.asarray(out0),
                               np.asarray(_reference(x, density, None)),
                               rtol=1e-6, atol=1e-6)

    # Case 3: small-k peel path (k = 5), boosted, non-divisible row grid
    # (B*C = 12 rows, tile = 8 -> partial last block).
    B3, density3 = 3, 0.02
    x3 = jax.random.normal(kx2, (B3, C, H, W), dtype=jnp.float32)
    layer3 = KWinnerLayer2D((H, W), C, density3, boost_factor=boost)
    layer3.active_average = jax.random.uniform(ka2, (C, H, W), jnp.float32,
                                               minval=0.0, maxval=0.3)
    out3 = jax.block_until_ready(layer3(x3))
    factor3 = jnp.exp((density3 - layer3.active_average) * boost)
    np.testing.assert_allclose(np.asarray(out3),
                               np.asarray(_reference(x3, density3, factor3)),
                               rtol=1e-6, atol=1e-6)

    # Case 4: bisection, un-boosted, non-divisible row grid.
    layer4 = KWinnerLayer2D((H, W), C, density, boost_factor=0)
    out4 = jax.block_until_ready(layer4(x3))
    np.testing.assert_allclose(np.asarray(out4),
                               np.asarray(_reference(x3, density, None)),
                               rtol=1e-6, atol=1e-6)

    print("KERNEL_OK")
</pallas_src>

<mosaic_0001>
module attributes {stable_mosaic.version = 11 : i64} {
  func.func @kernel(%arg0: i32, %arg1: memref<8x256xf32, #tpu.memory_space<vmem>>, %arg2: memref<8x256xf32, #tpu.memory_space<vmem>>, %arg3: memref<8x256xf32, #tpu.memory_space<vmem>>) attributes {dimension_semantics = [#tpu.dimension_semantics<parallel>], iteration_bounds = array<i64: 1>, scalar_prefetch = 0 : i64, scratch_operands = 0 : i64, tpu.core_type = #tpu.core_type<tc>, window_params = [{transform_indices = @transform_0, window_bounds = array<i64: 8, 256>}, {pipeline_mode = #tpu.pipeline_mode<synchronous>, transform_indices = @transform_1, window_bounds = array<i64: 8, 256>}, {transform_indices = @transform_2, window_bounds = array<i64: 8, 256>}]} {
    %c0 = arith.constant 0 : index
    %c0_0 = arith.constant 0 : index
    %0 = vector.load %arg1[%c0, %c0_0] : memref<8x256xf32, #tpu.memory_space<vmem>>, vector<8x256xf32>
    %c0_1 = arith.constant 0 : index
    %c0_2 = arith.constant 0 : index
    %1 = vector.load %arg2[%c0_1, %c0_2] : memref<8x256xf32, #tpu.memory_space<vmem>>, vector<8x256xf32>
    %2 = arith.mulf %0, %1 : vector<8x256xf32>
    %3 = tpu.bitcast %2 : vector<8x256xf32> -> vector<8x256xi32>
    %c31_i32 = arith.constant 31 : i32
    %4 = vector.broadcast %c31_i32 : i32 to vector<8x256xi32>
    %5 = arith.shrsi %3, %4 : vector<8x256xi32>
    %c2147483647_i32 = arith.constant 2147483647 : i32
    %6 = vector.broadcast %c2147483647_i32 : i32 to vector<8x256xi32>
    %7 = arith.andi %5, %6 : vector<8x256xi32>
    %8 = arith.xori %3, %7 : vector<8x256xi32>
    %c0_i32 = arith.constant 0 : i32
    %9 = vector.broadcast %c0_i32 : i32 to vector<8x1xi32>
    %c-2147483648_i32 = arith.constant -2147483648 : i32
    %10 = vector.broadcast %c-2147483648_i32 : i32 to vector<8x1xi32>
    %11 = arith.ori %9, %10 : vector<8x1xi32>
    %c-2147483648_i32_3 = arith.constant -2147483648 : i32
    %12 = vector.broadcast %c-2147483648_i32_3 : i32 to vector<8x1xi32>
    %13 = arith.xori %11, %12 : vector<8x1xi32>
    %14 = vector.broadcast %13 : vector<8x1xi32> to vector<8x256xi32>
    %15 = arith.cmpi sge, %8, %14 : vector<8x256xi32>
    %16 = arith.extui %15 : vector<8x256xi1> to vector<8x256xi32>
    %cst = arith.constant dense<0> : vector<8xi32>
    %17 = vector.multi_reduction <add>, %16, %cst [1] : vector<8x256xi32> to vector<8xi32>
    %18 = vector.shape_cast %17 : vector<8xi32> to vector<8x1xi32>
    %c25_i32 = arith.constant 25 : i32
    %19 = vector.broadcast %c25_i32 : i32 to vector<8x1xi32>
    %20 = arith.cmpi sge, %18, %19 : vector<8x1xi32>
    %21 = arith.select %20, %11, %9 : vector<8x1xi1>, vector<8x1xi32>
    %c1073741824_i32 = arith.constant 1073741824 : i32
    %22 = vector.broadcast %c1073741824_i32 : i32 to vector<8x1xi32>
    %23 = arith.ori %21, %22 : vector<8x1xi32>
    %c-2147483648_i32_4 = arith.constant -2147483648 : i32
    %24 = vector.broadcast %c-2147483648_i32_4 : i32 to vector<8x1xi32>
    %25 = arith.xori %23, %24 : vector<8x1xi32>
    %26 = vector.broadcast %25 : vector<8x1xi32> to vector<8x256xi32>
    %27 = arith.cmpi sge, %8, %26 : vector<8x256xi32>
    %28 = arith.extui %27 : vector<8x256xi1> to vector<8x256xi32>
    %cst_5 = arith.constant dense<0> : vector<8xi32>
    %29 = vector.multi_reduction <add>, %28, %cst_5 [1] : vector<8x256xi32> to vector<8xi32>
    %30 = vector.shape_cast %29 : vector<8xi32> to vector<8x1xi32>
    %c25_i32_6 = arith.constant 25 : i32
    %31 = vector.broadcast %c25_i32_6 : i32 to vector<8x1xi32>
    %32 = arith.cmpi sge, %30, %31 : vector<8x1xi32>
    %33 = arith.select %32, %23, %21 : vector<8x1xi1>, vector<8x1xi32>
    %c536870912_i32 = arith.constant 536870912 : i32
    %34 = vector.broadcast %c536870912_i32 : i32 to vector<8x1xi32>
    %35 = arith.ori %33, %34 : vector<8x1xi32>
    %c-2147483648_i32_7 = arith.constant -2147483648 : i32
    %36 = vector.broadcast %c-2147483648_i32_7 : i32 to vector<8x1xi32>
    %37 = arith.xori %35, %36 : vector<8x1xi32>
    %38 = vector.broadcast %37 : vector<8x1xi32> to vector<8x256xi32>
    %39 = arith.cmpi sge, %8, %38 : vector<8x256xi32>
    %40 = arith.extui %39 : vector<8x256xi1> to vector<8x256xi32>
    %cst_8 = arith.constant dense<0> : vector<8xi32>
    %41 = vector.multi_reduction <add>, %40, %cst_8 [1] : vector<8x256xi32> to vector<8xi32>
    %42 = vector.shape_cast %41 : vector<8xi32> to vector<8x1xi32>
    %c25_i32_9 = arith.constant 25 : i32
    %43 = vector.broadcast %c25_i32_9 : i32 to vector<8x1xi32>
    %44 = arith.cmpi sge, %42, %43 : vector<8x1xi32>
    %45 = arith.select %44, %35, %33 : vector<8x1xi1>, vector<8x1xi32>
    %c268435456_i32 = arith.constant 268435456 : i32
    %46 = vector.broadcast %c268435456_i32 : i32 to vector<8x1xi32>
    %47 = arith.ori %45, %46 : vector<8x1xi32>
    %c-2147483648_i32_10 = arith.constant -2147483648 : i32
    %48 = vector.broadcast %c-2147483648_i32_10 : i32 to vector<8x1xi32>
    %49 = arith.xori %47, %48 : vector<8x1xi32>
    %50 = vector.broadcast %49 : vector<8x1xi32> to vector<8x256xi32>
    %51 = arith.cmpi sge, %8, %50 : vector<8x256xi32>
    %52 = arith.extui %51 : vector<8x256xi1> to vector<8x256xi32>
    %cst_11 = arith.constant dense<0> : vector<8xi32>
    %53 = vector.multi_reduction <add>, %52, %cst_11 [1] : vector<8x256xi32> to vector<8xi32>
    %54 = vector.shape_cast %53 : vector<8xi32> to vector<8x1xi32>
    %c25_i32_12 = arith.constant 25 : i32
    %55 = vector.broadcast %c25_i32_12 : i32 to vector<8x1xi32>
    %56 = arith.cmpi sge, %54, %55 : vector<8x1xi32>
    %57 = arith.select %56, %47, %45 : vector<8x1xi1>, vector<8x1xi32>
    %c134217728_i32 = arith.constant 134217728 : i32
    %58 = vector.broadcast %c134217728_i32 : i32 to vector<8x1xi32>
    %59 = arith.ori %57, %58 : vector<8x1xi32>
    %c-2147483648_i32_13 = arith.constant -2147483648 : i32
    %60 = vector.broadcast %c-2147483648_i32_13 : i32 to vector<8x1xi32>
    %61 = arith.xori %59, %60 : vector<8x1xi32>
    %62 = vector.broadcast %61 : vector<8x1xi32> to vector<8x256xi32>
    %63 = arith.cmpi sge, %8, %62 : vector<8x256xi32>
    %64 = arith.extui %63 : vector<8x256xi1> to vector<8x256xi32>
    %cst_14 = arith.constant dense<0> : vector<8xi32>
    %65 = vector.multi_reduction <add>, %64, %cst_14 [1] : vector<8x256xi32> to vector<8xi32>
    %66 = vector.shape_cast %65 : vector<8xi32> to vector<8x1xi32>
    %c25_i32_15 = arith.constant 25 : i32
    %67 = vector.broadcast %c25_i32_15 : i32 to vector<8x1xi32>
    %68 = arith.cmpi sge, %66, %67 : vector<8x1xi32>
    %69 = arith.select %68, %59, %57 : vector<8x1xi1>, vector<8x1xi32>
    %c67108864_i32 = arith.constant 67108864 : i32
    %70 = vector.broadcast %c67108864_i32 : i32 to vector<8x1xi32>
    %71 = arith.ori %69, %70 : vector<8x1xi32>
    %c-2147483648_i32_16 = arith.constant -2147483648 : i32
    %72 = vector.broadcast %c-2147483648_i32_16 : i32 to vector<8x1xi32>
    %73 = arith.xori %71, %72 : vector<8x1xi32>
    %74 = vector.broadcast %73 : vector<8x1xi32> to vector<8x256xi32>
    %75 = arith.cmpi sge, %8, %74 : vector<8x256xi32>
    %76 = arith.extui %75 : vector<8x256xi1> to vector<8x256xi32>
    %cst_17 = arith.constant dense<0> : vector<8xi32>
    %77 = vector.multi_reduction <add>, %76, %cst_17 [1] : vector<8x256xi32> to vector<8xi32>
    %78 = vector.shape_cast %77 : vector<8xi32> to vector<8x1xi32>
    %c25_i32_18 = arith.constant 25 : i32
    %79 = vector.broadcast %c25_i32_18 : i32 to vector<8x1xi32>
    %80 = arith.cmpi sge, %78, %79 : vector<8x1xi32>
    %81 = arith.select %80, %71, %69 : vector<8x1xi1>, vector<8x1xi32>
    %c33554432_i32 = arith.constant 33554432 : i32
    %82 = vector.broadcast %c33554432_i32 : i32 to vector<8x1xi32>
    %83 = arith.ori %81, %82 : vector<8x1xi32>
    %c-2147483648_i32_19 = arith.constant -2147483648 : i32
    %84 = vector.broadcast %c-2147483648_i32_19 : i32 to vector<8x1xi32>
    %85 = arith.xori %83, %84 : vector<8x1xi32>
    %86 = vector.broadcast %85 : vector<8x1xi32> to vector<8x256xi32>
    %87 = arith.cmpi sge, %8, %86 : vector<8x256xi32>
    %88 = arith.extui %87 : vector<8x256xi1> to vector<8x256xi32>
    %cst_20 = arith.constant dense<0> : vector<8xi32>
    %89 = vector.multi_reduction <add>, %88, %cst_20 [1] : vector<8x256xi32> to vector<8xi32>
    %90 = vector.shape_cast %89 : vector<8xi32> to vector<8x1xi32>
    %c25_i32_21 = arith.constant 25 : i32
    %91 = vector.broadcast %c25_i32_21 : i32 to vector<8x1xi32>
    %92 = arith.cmpi sge, %90, %91 : vector<8x1xi32>
    %93 = arith.select %92, %83, %81 : vector<8x1xi1>, vector<8x1xi32>
    %c16777216_i32 = arith.constant 16777216 : i32
    %94 = vector.broadcast %c16777216_i32 : i32 to vector<8x1xi32>
    %95 = arith.ori %93, %94 : vector<8x1xi32>
    %c-2147483648_i32_22 = arith.constant -2147483648 : i32
    %96 = vector.broadcast %c-2147483648_i32_22 : i32 to vector<8x1xi32>
    %97 = arith.xori %95, %96 : vector<8x1xi32>
    %98 = vector.broadcast %97 : vector<8x1xi32> to vector<8x256xi32>
    %99 = arith.cmpi sge, %8, %98 : vector<8x256xi32>
    %100 = arith.extui %99 : vector<8x256xi1> to vector<8x256xi32>
    %cst_23 = arith.constant dense<0> : vector<8xi32>
    %101 = vector.multi_reduction <add>, %100, %cst_23 [1] : vector<8x256xi32> to vector<8xi32>
    %102 = vector.shape_cast %101 : vector<8xi32> to vector<8x1xi32>
    %c25_i32_24 = arith.constant 25 : i32
    %103 = vector.broadcast %c25_i32_24 : i32 to vector<8x1xi32>
    %104 = arith.cmpi sge, %102, %103 : vector<8x1xi32>
    %105 = arith.select %104, %95, %93 : vector<8x1xi1>, vector<8x1xi32>
    %c8388608_i32 = arith.constant 8388608 : i32
    %106 = vector.broadcast %c8388608_i32 : i32 to vector<8x1xi32>
    %107 = arith.ori %105, %106 : vector<8x1xi32>
    %c-2147483648_i32_25 = arith.constant -2147483648 : i32
    %108 = vector.broadcast %c-2147483648_i32_25 : i32 to vector<8x1xi32>
    %109 = arith.xori %107, %108 : vector<8x1xi32>
    %110 = vector.broadcast %109 : vector<8x1xi32> to vector<8x256xi32>
    %111 = arith.cmpi sge, %8, %110 : vector<8x256xi32>
    %112 = arith.extui %111 : vector<8x256xi1> to vector<8x256xi32>
    %cst_26 = arith.constant dense<0> : vector<8xi32>
    %113 = vector.multi_reduction <add>, %112, %cst_26 [1] : vector<8x256xi32> to vector<8xi32>
    %114 = vector.shape_cast %113 : vector<8xi32> to vector<8x1xi32>
    %c25_i32_27 = arith.constant 25 : i32
    %115 = vector.broadcast %c25_i32_27 : i32 to vector<8x1xi32>
    %116 = arith.cmpi sge, %114, %115 : vector<8x1xi32>
    %117 = arith.select %116, %107, %105 : vector<8x1xi1>, vector<8x1xi32>
    %c4194304_i32 = arith.constant 4194304 : i32
    %118 = vector.broadcast %c4194304_i32 : i32 to vector<8x1xi32>
    %119 = arith.ori %117, %118 : vector<8x1xi32>
    %c-2147483648_i32_28 = arith.constant -2147483648 : i32
    %120 = vector.broadcast %c-2147483648_i32_28 : i32 to vector<8x1xi32>
    %121 = arith.xori %119, %120 : vector<8x1xi32>
    %122 = vector.broadcast %121 : vector<8x1xi32> to vector<8x256xi32>
    %123 = arith.cmpi sge, %8, %122 : vector<8x256xi32>
    %124 = arith.extui %123 : vector<8x256xi1> to vector<8x256xi32>
    %cst_29 = arith.constant dense<0> : vector<8xi32>
    %125 = vector.multi_reduction <add>, %124, %cst_29 [1] : vector<8x256xi32> to vector<8xi32>
    %126 = vector.shape_cast %125 : vector<8xi32> to vector<8x1xi32>
    %c25_i32_30 = arith.constant 25 : i32
    %127 = vector.broadcast %c25_i32_30 : i32 to vector<8x1xi32>
    %128 = arith.cmpi sge, %126, %127 : vector<8x1xi32>
    %129 = arith.select %128, %119, %117 : vector<8x1xi1>, vector<8x1xi32>
    %c2097152_i32 = arith.constant 2097152 : i32
    %130 = vector.broadcast %c2097152_i32 : i32 to vector<8x1xi32>
    %131 = arith.ori %129, %130 : vector<8x1xi32>
    %c-2147483648_i32_31 = arith.constant -2147483648 : i32
    %132 = vector.broadcast %c-2147483648_i32_31 : i32 to vector<8x1xi32>
    %133 = arith.xori %131, %132 : vector<8x1xi32>
    %134 = vector.broadcast %133 : vector<8x1xi32> to vector<8x256xi32>
    %135 = arith.cmpi sge, %8, %134 : vector<8x256xi32>
    %136 = arith.extui %135 : vector<8x256xi1> to vector<8x256xi32>
    %cst_32 = arith.constant dense<0> : vector<8xi32>
    %137 = vector.multi_reduction <add>, %136, %cst_32 [1] : vector<8x256xi32> to vector<8xi32>
    %138 = vector.shape_cast %137 : vector<8xi32> to vector<8x1xi32>
    %c25_i32_33 = arith.constant 25 : i32
    %139 = vector.broadcast %c25_i32_33 : i32 to vector<8x1xi32>
    %140 = arith.cmpi sge, %138, %139 : vector<8x1xi32>
    %141 = arith.select %140, %131, %129 : vector<8x1xi1>, vector<8x1xi32>
    %c1048576_i32 = arith.constant 1048576 : i32
    %142 = vector.broadcast %c1048576_i32 : i32 to vector<8x1xi32>
    %143 = arith.ori %141, %142 : vector<8x1xi32>
    %c-2147483648_i32_34 = arith.constant -2147483648 : i32
    %144 = vector.broadcast %c-2147483648_i32_34 : i32 to vector<8x1xi32>
    %145 = arith.xori %143, %144 : vector<8x1xi32>
    %146 = vector.broadcast %145 : vector<8x1xi32> to vector<8x256xi32>
    %147 = arith.cmpi sge, %8, %146 : vector<8x256xi32>
    %148 = arith.extui %147 : vector<8x256xi1> to vector<8x256xi32>
    %cst_35 = arith.constant dense<0> : vector<8xi32>
    %149 = vector.multi_reduction <add>, %148, %cst_35 [1] : vector<8x256xi32> to vector<8xi32>
    %150 = vector.shape_cast %149 : vector<8xi32> to vector<8x1xi32>
    %c25_i32_36 = arith.constant 25 : i32
    %151 = vector.broadcast %c25_i32_36 : i32 to vector<8x1xi32>
    %152 = arith.cmpi sge, %150, %151 : vector<8x1xi32>
    %153 = arith.select %152, %143, %141 : vector<8x1xi1>, vector<8x1xi32>
    %c524288_i32 = arith.constant 524288 : i32
    %154 = vector.broadcast %c524288_i32 : i32 to vector<8x1xi32>
    %155 = arith.ori %153, %154 : vector<8x1xi32>
    %c-2147483648_i32_37 = arith.constant -2147483648 : i32
    %156 = vector.broadcast %c-2147483648_i32_37 : i32 to vector<8x1xi32>
    %157 = arith.xori %155, %156 : vector<8x1xi32>
    %158 = vector.broadcast %157 : vector<8x1xi32> to vector<8x256xi32>
    %159 = arith.cmpi sge, %8, %158 : vector<8x256xi32>
    %160 = arith.extui %159 : vector<8x256xi1> to vector<8x256xi32>
    %cst_38 = arith.constant dense<0> : vector<8xi32>
    %161 = vector.multi_reduction <add>, %160, %cst_38 [1] : vector<8x256xi32> to vector<8xi32>
    %162 = vector.shape_cast %161 : vector<8xi32> to vector<8x1xi32>
    %c25_i32_39 = arith.constant 25 : i32
    %163 = vector.broadcast %c25_i32_39 : i32 to vector<8x1xi32>
    %164 = arith.cmpi sge, %162, %163 : vector<8x1xi32>
    %165 = arith.select %164, %155, %153 : vector<8x1xi1>, vector<8x1xi32>
    %c262144_i32 = arith.constant 262144 : i32
    %166 = vector.broadcast %c262144_i32 : i32 to vector<8x1xi32>
    %167 = arith.ori %165, %166 : vector<8x1xi32>
    %c-2147483648_i32_40 = arith.constant -2147483648 : i32
    %168 = vector.broadcast %c-2147483648_i32_40 : i32 to vector<8x1xi32>
    %169 = arith.xori %167, %168 : vector<8x1xi32>
    %170 = vector.broadcast %169 : vector<8x1xi32> to vector<8x256xi32>
    %171 = arith.cmpi sge, %8, %170 : vector<8x256xi32>
    %172 = arith.extui %171 : vector<8x256xi1> to vector<8x256xi32>
    %cst_41 = arith.constant dense<0> : vector<8xi32>
    %173 = vector.multi_reduction <add>, %172, %cst_41 [1] : vector<8x256xi32> to vector<8xi32>
    %174 = vector.shape_cast %173 : vector<8xi32> to vector<8x1xi32>
    %c25_i32_42 = arith.constant 25 : i32
    %175 = vector.broadcast %c25_i32_42 : i32 to vector<8x1xi32>
    %176 = arith.cmpi sge, %174, %175 : vector<8x1xi32>
    %177 = arith.select %176, %167, %165 : vector<8x1xi1>, vector<8x1xi32>
    %c131072_i32 = arith.constant 131072 : i32
    %178 = vector.broadcast %c131072_i32 : i32 to vector<8x1xi32>
    %179 = arith.ori %177, %178 : vector<8x1xi32>
    %c-2147483648_i32_43 = arith.constant -2147483648 : i32
    %180 = vector.broadcast %c-2147483648_i32_43 : i32 to vector<8x1xi32>
    %181 = arith.xori %179, %180 : vector<8x1xi32>
    %182 = vector.broadcast %181 : vector<8x1xi32> to vector<8x256xi32>
    %183 = arith.cmpi sge, %8, %182 : vector<8x256xi32>
    %184 = arith.extui %183 : vector<8x256xi1> to vector<8x256xi32>
    %cst_44 = arith.constant dense<0> : vector<8xi32>
    %185 = vector.multi_reduction <add>, %184, %cst_44 [1] : vector<8x256xi32> to vector<8xi32>
    %186 = vector.shape_cast %185 : vector<8xi32> to vector<8x1xi32>
    %c25_i32_45 = arith.constant 25 : i32
    %187 = vector.broadcast %c25_i32_45 : i32 to vector<8x1xi32>
    %188 = arith.cmpi sge, %186, %187 : vector<8x1xi32>
    %189 = arith.select %188, %179, %177 : vector<8x1xi1>, vector<8x1xi32>
    %c65536_i32 = arith.constant 65536 : i32
    %190 = vector.broadcast %c65536_i32 : i32 to vector<8x1xi32>
    %191 = arith.ori %189, %190 : vector<8x1xi32>
    %c-2147483648_i32_46 = arith.constant -2147483648 : i32
    %192 = vector.broadcast %c-2147483648_i32_46 : i32 to vector<8x1xi32>
    %193 = arith.xori %191, %192 : vector<8x1xi32>
    %194 = vector.broadcast %193 : vector<8x1xi32> to vector<8x256xi32>
    %195 = arith.cmpi sge, %8, %194 : vector<8x256xi32>
    %196 = arith.extui %195 : vector<8x256xi1> to vector<8x256xi32>
    %cst_47 = arith.constant dense<0> : vector<8xi32>
    %197 = vector.multi_reduction <add>, %196, %cst_47 [1] : vector<8x256xi32> to vector<8xi32>
    %198 = vector.shape_cast %197 : vector<8xi32> to vector<8x1xi32>
    %c25_i32_48 = arith.constant 25 : i32
    %199 = vector.broadcast %c25_i32_48 : i32 to vector<8x1xi32>
    %200 = arith.cmpi sge, %198, %199 : vector<8x1xi32>
    %201 = arith.select %200, %191, %189 : vector<8x1xi1>, vector<8x1xi32>
    %c32768_i32 = arith.constant 32768 : i32
    %202 = vector.broadcast %c32768_i32 : i32 to vector<8x1xi32>
    %203 = arith.ori %201, %202 : vector<8x1xi32>
    %c-2147483648_i32_49 = arith.constant -2147483648 : i32
    %204 = vector.broadcast %c-2147483648_i32_49 : i32 to vector<8x1xi32>
    %205 = arith.xori %203, %204 : vector<8x1xi32>
    %206 = vector.broadcast %205 : vector<8x1xi32> to vector<8x256xi32>
    %207 = arith.cmpi sge, %8, %206 : vector<8x256xi32>
    %208 = arith.extui %207 : vector<8x256xi1> to vector<8x256xi32>
    %cst_50 = arith.constant dense<0> : vector<8xi32>
    %209 = vector.multi_reduction <add>, %208, %cst_50 [1] : vector<8x256xi32> to vector<8xi32>
    %210 = vector.shape_cast %209 : vector<8xi32> to vector<8x1xi32>
    %c25_i32_51 = arith.constant 25 : i32
    %211 = vector.broadcast %c25_i32_51 : i32 to vector<8x1xi32>
    %212 = arith.cmpi sge, %210, %211 : vector<8x1xi32>
    %213 = arith.select %212, %203, %201 : vector<8x1xi1>, vector<8x1xi32>
    %c16384_i32 = arith.constant 16384 : i32
    %214 = vector.broadcast %c16384_i32 : i32 to vector<8x1xi32>
    %215 = arith.ori %213, %214 : vector<8x1xi32>
    %c-2147483648_i32_52 = arith.constant -2147483648 : i32
    %216 = vector.broadcast %c-2147483648_i32_52 : i32 to vector<8x1xi32>
    %217 = arith.xori %215, %216 : vector<8x1xi32>
    %218 = vector.broadcast %217 : vector<8x1xi32> to vector<8x256xi32>
    %219 = arith.cmpi sge, %8, %218 : vector<8x256xi32>
    %220 = arith.extui %219 : vector<8x256xi1> to vector<8x256xi32>
    %cst_53 = arith.constant dense<0> : vector<8xi32>
    %221 = vector.multi_reduction <add>, %220, %cst_53 [1] : vector<8x256xi32> to vector<8xi32>
    %222 = vector.shape_cast %221 : vector<8xi32> to vector<8x1xi32>
    %c25_i32_54 = arith.constant 25 : i32
    %223 = vector.broadcast %c25_i32_54 : i32 to vector<8x1xi32>
    %224 = arith.cmpi sge, %222, %223 : vector<8x1xi32>
    %225 = arith.select %224, %215, %213 : vector<8x1xi1>, vector<8x1xi32>
    %c8192_i32 = arith.constant 8192 : i32
    %226 = vector.broadcast %c8192_i32 : i32 to vector<8x1xi32>
    %227 = arith.ori %225, %226 : vector<8x1xi32>
    %c-2147483648_i32_55 = arith.constant -2147483648 : i32
    %228 = vector.broadcast %c-2147483648_i32_55 : i32 to vector<8x1xi32>
    %229 = arith.xori %227, %228 : vector<8x1xi32>
    %230 = vector.broadcast %229 : vector<8x1xi32> to vector<8x256xi32>
    %231 = arith.cmpi sge, %8, %230 : vector<8x256xi32>
    %232 = arith.extui %231 : vector<8x256xi1> to vector<8x256xi32>
    %cst_56 = arith.constant dense<0> : vector<8xi32>
    %233 = vector.multi_reduction <add>, %232, %cst_56 [1] : vector<8x256xi32> to vector<8xi32>
    %234 = vector.shape_cast %233 : vector<8xi32> to vector<8x1xi32>
    %c25_i32_57 = arith.constant 25 : i32
    %235 = vector.broadcast %c25_i32_57 : i32 to vector<8x1xi32>
    %236 = arith.cmpi sge, %234, %235 : vector<8x1xi32>
    %237 = arith.select %236, %227, %225 : vector<8x1xi1>, vector<8x1xi32>
    %c4096_i32 = arith.constant 4096 : i32
    %238 = vector.broadcast %c4096_i32 : i32 to vector<8x1xi32>
    %239 = arith.ori %237, %238 : vector<8x1xi32>
    %c-2147483648_i32_58 = arith.constant -2147483648 : i32
    %240 = vector.broadcast %c-2147483648_i32_58 : i32 to vector<8x1xi32>
    %241 = arith.xori %239, %240 : vector<8x1xi32>
    %242 = vector.broadcast %241 : vector<8x1xi32> to vector<8x256xi32>
    %243 = arith.cmpi sge, %8, %242 : vector<8x256xi32>
    %244 = arith.extui %243 : vector<8x256xi1> to vector<8x256xi32>
    %cst_59 = arith.constant dense<0> : vector<8xi32>
    %245 = vector.multi_reduction <add>, %244, %cst_59 [1] : vector<8x256xi32> to vector<8xi32>
    %246 = vector.shape_cast %245 : vector<8xi32> to vector<8x1xi32>
    %c25_i32_60 = arith.constant 25 : i32
    %247 = vector.broadcast %c25_i32_60 : i32 to vector<8x1xi32>
    %248 = arith.cmpi sge, %246, %247 : vector<8x1xi32>
    %249 = arith.select %248, %239, %237 : vector<8x1xi1>, vector<8x1xi32>
    %c2048_i32 = arith.constant 2048 : i32
    %250 = vector.broadcast %c2048_i32 : i32 to vector<8x1xi32>
    %251 = arith.ori %249, %250 : vector<8x1xi32>
    %c-2147483648_i32_61 = arith.constant -2147483648 : i32
    %252 = vector.broadcast %c-2147483648_i32_61 : i32 to vector<8x1xi32>
    %253 = arith.xori %251, %252 : vector<8x1xi32>
    %254 = vector.broadcast %253 : vector<8x1xi32> to vector<8x256xi32>
    %255 = arith.cmpi sge, %8, %254 : vector<8x256xi32>
    %256 = arith.extui %255 : vector<8x256xi1> to vector<8x256xi32>
    %cst_62 = arith.constant dense<0> : vector<8xi32>
    %257 = vector.multi_reduction <add>, %256, %cst_62 [1] : vector<8x256xi32> to vector<8xi32>
    %258 = vector.shape_cast %257 : vector<8xi32> to vector<8x1xi32>
    %c25_i32_63 = arith.constant 25 : i32
    %259 = vector.broadcast %c25_i32_63 : i32 to vector<8x1xi32>
    %260 = arith.cmpi sge, %258, %259 : vector<8x1xi32>
    %261 = arith.select %260, %251, %249 : vector<8x1xi1>, vector<8x1xi32>
    %c1024_i32 = arith.constant 1024 : i32
    %262 = vector.broadcast %c1024_i32 : i32 to vector<8x1xi32>
    %263 = arith.ori %261, %262 : vector<8x1xi32>
    %c-2147483648_i32_64 = arith.constant -2147483648 : i32
    %264 = vector.broadcast %c-2147483648_i32_64 : i32 to vector<8x1xi32>
    %265 = arith.xori %263, %264 : vector<8x1xi32>
    %266 = vector.broadcast %265 : vector<8x1xi32> to vector<8x256xi32>
    %267 = arith.cmpi sge, %8, %266 : vector<8x256xi32>
    %268 = arith.extui %267 : vector<8x256xi1> to vector<8x256xi32>
    %cst_65 = arith.constant dense<0> : vector<8xi32>
    %269 = vector.multi_reduction <add>, %268, %cst_65 [1] : vector<8x256xi32> to vector<8xi32>
    %270 = vector.shape_cast %269 : vector<8xi32> to vector<8x1xi32>
    %c25_i32_66 = arith.constant 25 : i32
    %271 = vector.broadcast %c25_i32_66 : i32 to vector<8x1xi32>
    %272 = arith.cmpi sge, %270, %271 : vector<8x1xi32>
    %273 = arith.select %272, %263, %261 : vector<8x1xi1>, vector<8x1xi32>
    %c512_i32 = arith.constant 512 : i32
    %274 = vector.broadcast %c512_i32 : i32 to vector<8x1xi32>
    %275 = arith.ori %273, %274 : vector<8x1xi32>
    %c-2147483648_i32_67 = arith.constant -2147483648 : i32
    %276 = vector.broadcast %c-2147483648_i32_67 : i32 to vector<8x1xi32>
    %277 = arith.xori %275, %276 : vector<8x1xi32>
    %278 = vector.broadcast %277 : vector<8x1xi32> to vector<8x256xi32>
    %279 = arith.cmpi sge, %8, %278 : vector<8x256xi32>
    %280 = arith.extui %279 : vector<8x256xi1> to vector<8x256xi32>
    %cst_68 = arith.constant dense<0> : vector<8xi32>
    %281 = vector.multi_reduction <add>, %280, %cst_68 [1] : vector<8x256xi32> to vector<8xi32>
    %282 = vector.shape_cast %281 : vector<8xi32> to vector<8x1xi32>
    %c25_i32_69 = arith.constant 25 : i32
    %283 = vector.broadcast %c25_i32_69 : i32 to vector<8x1xi32>
    %284 = arith.cmpi sge, %282, %283 : vector<8x1xi32>
    %285 = arith.select %284, %275, %273 : vector<8x1xi1>, vector<8x1xi32>
    %c256_i32 = arith.constant 256 : i32
    %286 = vector.broadcast %c256_i32 : i32 to vector<8x1xi32>
    %287 = arith.ori %285, %286 : vector<8x1xi32>
    %c-2147483648_i32_70 = arith.constant -2147483648 : i32
    %288 = vector.broadcast %c-2147483648_i32_70 : i32 to vector<8x1xi32>
    %289 = arith.xori %287, %288 : vector<8x1xi32>
    %290 = vector.broadcast %289 : vector<8x1xi32> to vector<8x256xi32>
    %291 = arith.cmpi sge, %8, %290 : vector<8x256xi32>
    %292 = arith.extui %291 : vector<8x256xi1> to vector<8x256xi32>
    %cst_71 = arith.constant dense<0> : vector<8xi32>
    %293 = vector.multi_reduction <add>, %292, %cst_71 [1] : vector<8x256xi32> to vector<8xi32>
    %294 = vector.shape_cast %293 : vector<8xi32> to vector<8x1xi32>
    %c25_i32_72 = arith.constant 25 : i32
    %295 = vector.broadcast %c25_i32_72 : i32 to vector<8x1xi32>
    %296 = arith.cmpi sge, %294, %295 : vector<8x1xi32>
    %297 = arith.select %296, %287, %285 : vector<8x1xi1>, vector<8x1xi32>
    %c128_i32 = arith.constant 128 : i32
    %298 = vector.broadcast %c128_i32 : i32 to vector<8x1xi32>
    %299 = arith.ori %297, %298 : vector<8x1xi32>
    %c-2147483648_i32_73 = arith.constant -2147483648 : i32
    %300 = vector.broadcast %c-2147483648_i32_73 : i32 to vector<8x1xi32>
    %301 = arith.xori %299, %300 : vector<8x1xi32>
    %302 = vector.broadcast %301 : vector<8x1xi32> to vector<8x256xi32>
    %303 = arith.cmpi sge, %8, %302 : vector<8x256xi32>
    %304 = arith.extui %303 : vector<8x256xi1> to vector<8x256xi32>
    %cst_74 = arith.constant dense<0> : vector<8xi32>
    %305 = vector.multi_reduction <add>, %304, %cst_74 [1] : vector<8x256xi32> to vector<8xi32>
    %306 = vector.shape_cast %305 : vector<8xi32> to vector<8x1xi32>
    %c25_i32_75 = arith.constant 25 : i32
    %307 = vector.broadcast %c25_i32_75 : i32 to vector<8x1xi32>
    %308 = arith.cmpi sge, %306, %307 : vector<8x1xi32>
    %309 = arith.select %308, %299, %297 : vector<8x1xi1>, vector<8x1xi32>
    %c64_i32 = arith.constant 64 : i32
    %310 = vector.broadcast %c64_i32 : i32 to vector<8x1xi32>
    %311 = arith.ori %309, %310 : vector<8x1xi32>
    %c-2147483648_i32_76 = arith.constant -2147483648 : i32
    %312 = vector.broadcast %c-2147483648_i32_76 : i32 to vector<8x1xi32>
    %313 = arith.xori %311, %312 : vector<8x1xi32>
    %314 = vector.broadcast %313 : vector<8x1xi32> to vector<8x256xi32>
    %315 = arith.cmpi sge, %8, %314 : vector<8x256xi32>
    %316 = arith.extui %315 : vector<8x256xi1> to vector<8x256xi32>
    %cst_77 = arith.constant dense<0> : vector<8xi32>
    %317 = vector.multi_reduction <add>, %316, %cst_77 [1] : vector<8x256xi32> to vector<8xi32>
    %318 = vector.shape_cast %317 : vector<8xi32> to vector<8x1xi32>
    %c25_i32_78 = arith.constant 25 : i32
    %319 = vector.broadcast %c25_i32_78 : i32 to vector<8x1xi32>
    %320 = arith.cmpi sge, %318, %319 : vector<8x1xi32>
    %321 = arith.select %320, %311, %309 : vector<8x1xi1>, vector<8x1xi32>
    %c32_i32 = arith.constant 32 : i32
    %322 = vector.broadcast %c32_i32 : i32 to vector<8x1xi32>
    %323 = arith.ori %321, %322 : vector<8x1xi32>
    %c-2147483648_i32_79 = arith.constant -2147483648 : i32
    %324 = vector.broadcast %c-2147483648_i32_79 : i32 to vector<8x1xi32>
    %325 = arith.xori %323, %324 : vector<8x1xi32>
    %326 = vector.broadcast %325 : vector<8x1xi32> to vector<8x256xi32>
    %327 = arith.cmpi sge, %8, %326 : vector<8x256xi32>
    %328 = arith.extui %327 : vector<8x256xi1> to vector<8x256xi32>
    %cst_80 = arith.constant dense<0> : vector<8xi32>
    %329 = vector.multi_reduction <add>, %328, %cst_80 [1] : vector<8x256xi32> to vector<8xi32>
    %330 = vector.shape_cast %329 : vector<8xi32> to vector<8x1xi32>
    %c25_i32_81 = arith.constant 25 : i32
    %331 = vector.broadcast %c25_i32_81 : i32 to vector<8x1xi32>
    %332 = arith.cmpi sge, %330, %331 : vector<8x1xi32>
    %333 = arith.select %332, %323, %321 : vector<8x1xi1>, vector<8x1xi32>
    %c16_i32 = arith.constant 16 : i32
    %334 = vector.broadcast %c16_i32 : i32 to vector<8x1xi32>
    %335 = arith.ori %333, %334 : vector<8x1xi32>
    %c-2147483648_i32_82 = arith.constant -2147483648 : i32
    %336 = vector.broadcast %c-2147483648_i32_82 : i32 to vector<8x1xi32>
    %337 = arith.xori %335, %336 : vector<8x1xi32>
    %338 = vector.broadcast %337 : vector<8x1xi32> to vector<8x256xi32>
    %339 = arith.cmpi sge, %8, %338 : vector<8x256xi32>
    %340 = arith.extui %339 : vector<8x256xi1> to vector<8x256xi32>
    %cst_83 = arith.constant dense<0> : vector<8xi32>
    %341 = vector.multi_reduction <add>, %340, %cst_83 [1] : vector<8x256xi32> to vector<8xi32>
    %342 = vector.shape_cast %341 : vector<8xi32> to vector<8x1xi32>
    %c25_i32_84 = arith.constant 25 : i32
    %343 = vector.broadcast %c25_i32_84 : i32 to vector<8x1xi32>
    %344 = arith.cmpi sge, %342, %343 : vector<8x1xi32>
    %345 = arith.select %344, %335, %333 : vector<8x1xi1>, vector<8x1xi32>
    %c8_i32 = arith.constant 8 : i32
    %346 = vector.broadcast %c8_i32 : i32 to vector<8x1xi32>
    %347 = arith.ori %345, %346 : vector<8x1xi32>
    %c-2147483648_i32_85 = arith.constant -2147483648 : i32
    %348 = vector.broadcast %c-2147483648_i32_85 : i32 to vector<8x1xi32>
    %349 = arith.xori %347, %348 : vector<8x1xi32>
    %350 = vector.broadcast %349 : vector<8x1xi32> to vector<8x256xi32>
    %351 = arith.cmpi sge, %8, %350 : vector<8x256xi32>
    %352 = arith.extui %351 : vector<8x256xi1> to vector<8x256xi32>
    %cst_86 = arith.constant dense<0> : vector<8xi32>
    %353 = vector.multi_reduction <add>, %352, %cst_86 [1] : vector<8x256xi32> to vector<8xi32>
    %354 = vector.shape_cast %353 : vector<8xi32> to vector<8x1xi32>
    %c25_i32_87 = arith.constant 25 : i32
    %355 = vector.broadcast %c25_i32_87 : i32 to vector<8x1xi32>
    %356 = arith.cmpi sge, %354, %355 : vector<8x1xi32>
    %357 = arith.select %356, %347, %345 : vector<8x1xi1>, vector<8x1xi32>
    %c4_i32 = arith.constant 4 : i32
    %358 = vector.broadcast %c4_i32 : i32 to vector<8x1xi32>
    %359 = arith.ori %357, %358 : vector<8x1xi32>
    %c-2147483648_i32_88 = arith.constant -2147483648 : i32
    %360 = vector.broadcast %c-2147483648_i32_88 : i32 to vector<8x1xi32>
    %361 = arith.xori %359, %360 : vector<8x1xi32>
    %362 = vector.broadcast %361 : vector<8x1xi32> to vector<8x256xi32>
    %363 = arith.cmpi sge, %8, %362 : vector<8x256xi32>
    %364 = arith.extui %363 : vector<8x256xi1> to vector<8x256xi32>
    %cst_89 = arith.constant dense<0> : vector<8xi32>
    %365 = vector.multi_reduction <add>, %364, %cst_89 [1] : vector<8x256xi32> to vector<8xi32>
    %366 = vector.shape_cast %365 : vector<8xi32> to vector<8x1xi32>
    %c25_i32_90 = arith.constant 25 : i32
    %367 = vector.broadcast %c25_i32_90 : i32 to vector<8x1xi32>
    %368 = arith.cmpi sge, %366, %367 : vector<8x1xi32>
    %369 = arith.select %368, %359, %357 : vector<8x1xi1>, vector<8x1xi32>
    %c2_i32 = arith.constant 2 : i32
    %370 = vector.broadcast %c2_i32 : i32 to vector<8x1xi32>
    %371 = arith.ori %369, %370 : vector<8x1xi32>
    %c-2147483648_i32_91 = arith.constant -2147483648 : i32
    %372 = vector.broadcast %c-2147483648_i32_91 : i32 to vector<8x1xi32>
    %373 = arith.xori %371, %372 : vector<8x1xi32>
    %374 = vector.broadcast %373 : vector<8x1xi32> to vector<8x256xi32>
    %375 = arith.cmpi sge, %8, %374 : vector<8x256xi32>
    %376 = arith.extui %375 : vector<8x256xi1> to vector<8x256xi32>
    %cst_92 = arith.constant dense<0> : vector<8xi32>
    %377 = vector.multi_reduction <add>, %376, %cst_92 [1] : vector<8x256xi32> to vector<8xi32>
    %378 = vector.shape_cast %377 : vector<8xi32> to vector<8x1xi32>
    %c25_i32_93 = arith.constant 25 : i32
    %379 = vector.broadcast %c25_i32_93 : i32 to vector<8x1xi32>
    %380 = arith.cmpi sge, %378, %379 : vector<8x1xi32>
    %381 = arith.select %380, %371, %369 : vector<8x1xi1>, vector<8x1xi32>
    %c1_i32 = arith.constant 1 : i32
    %382 = vector.broadcast %c1_i32 : i32 to vector<8x1xi32>
    %383 = arith.ori %381, %382 : vector<8x1xi32>
    %c-2147483648_i32_94 = arith.constant -2147483648 : i32
    %384 = vector.broadcast %c-2147483648_i32_94 : i32 to vector<8x1xi32>
    %385 = arith.xori %383, %384 : vector<8x1xi32>
    %386 = vector.broadcast %385 : vector<8x1xi32> to vector<8x256xi32>
    %387 = arith.cmpi sge, %8, %386 : vector<8x256xi32>
    %388 = arith.extui %387 : vector<8x256xi1> to vector<8x256xi32>
    %cst_95 = arith.constant dense<0> : vector<8xi32>
    %389 = vector.multi_reduction <add>, %388, %cst_95 [1] : vector<8x256xi32> to vector<8xi32>
    %390 = vector.shape_cast %389 : vector<8xi32> to vector<8x1xi32>
    %c25_i32_96 = arith.constant 25 : i32
    %391 = vector.broadcast %c25_i32_96 : i32 to vector<8x1xi32>
    %392 = arith.cmpi sge, %390, %391 : vector<8x1xi32>
    %393 = arith.select %392, %383, %381 : vector<8x1xi1>, vector<8x1xi32>
    %c-2147483648_i32_97 = arith.constant -2147483648 : i32
    %394 = vector.broadcast %c-2147483648_i32_97 : i32 to vector<8x1xi32>
    %395 = arith.xori %393, %394 : vector<8x1xi32>
    %396 = vector.broadcast %395 : vector<8x1xi32> to vector<8x256xi32>
    %397 = arith.cmpi sge, %8, %396 : vector<8x256xi32>
    %c0_98 = arith.constant 0 : index
    %c0_99 = arith.constant 0 : index
    %398 = vector.load %arg1[%c0_98, %c0_99] : memref<8x256xf32, #tpu.memory_space<vmem>>, vector<8x256xf32>
    %c0_i32_100 = arith.constant 0 : i32
    %399 = arith.sitofp %c0_i32_100 : i32 to f32
    %400 = vector.broadcast %399 : f32 to vector<8x256xf32>
    %401 = arith.select %397, %398, %400 : vector<8x256xi1>, vector<8x256xf32>
    %c0_101 = arith.constant 0 : index
    %c0_102 = arith.constant 0 : index
    %402 = vector.load %arg3[%c0_101, %c0_102] : memref<8x256xf32, #tpu.memory_space<vmem>>, vector<8x256xf32>
    tpu.vector_store %arg3[%c0_101, %c0_102], %401 {strides = array<i32>} : memref<8x256xf32, #tpu.memory_space<vmem>>, vector<8x256xf32>,
    return
  }
  func.func @transform_0(%arg0: i32) -> (i32, i32) {
    %c0_i32 = arith.constant 0 : i32
    %c0_i32_0 = arith.constant 0 : i32
    return %arg0, %c0_i32 : i32, i32
  }
  func.func @transform_1(%arg0: i32) -> (i32, i32) {
    %c0_i32 = arith.constant 0 : i32
    %c0_i32_0 = arith.constant 0 : i32
    %c0_i32_1 = arith.constant 0 : i32
    return %c0_i32, %c0_i32_0 : i32, i32
  }
  func.func @transform_2(%arg0: i32) -> (i32, i32) {
    %c0_i32 = arith.constant 0 : i32
    %c0_i32_0 = arith.constant 0 : i32
    return %arg0, %c0_i32 : i32, i32
  }
}

</mosaic_0001>

<bundles_post_ra>
// kernel: tpu_custom_call.1
= control target key start
LH: loop header
LB: loop body
LE: loop exit
PB: predicated region body
PF: predicated region fallthrough
CT: control target
= control target key end

     0   :  { %7 = vsyncpa [#allocation3], 0  ;;  %s996_s0 = inlined_call_operand.hbm [shape: f32[8,256], index: 0, kind: input, shape index: {}]   ;;  %s997_s1 = inlined_call_operand.hbm [shape: f32[8,256], index: 1, kind: input, shape index: {}]   ;;  %s998_s2 = inlined_call_operand.hbm [shape: f32[8,256], index: 2, kind: output, shape index: {}]  }
   0x1   :  { %8 = vsyncpa [#allocation6], 0 }
   0x2   :  { %9 = vsyncpa [#allocation4], 0  ;;  %s15_s11 = sshll.u32 %s996_s0, 4  ;;  %s833_s12 = smov [#allocation2]   ;;  %s16_s11 = int_to_ptr.hbm [resolvable:$true] %s15_s11 }
   0x3   :  { %s17_s13 = sshll.u32 %s833_s12, 4  ;;  %s26_s16 = sshll.u32 %s997_s1, 4  ;;  %s18_s13 = int_to_ptr.vmem [resolvable:$true] %s17_s13  ;;  %s27_s16 = int_to_ptr.hbm [resolvable:$true] %s26_s16 }
   0x4   :  { %20 = dma.hbm_to_vmem [thread:$0]  %s16_s11, 256, %s18_s13, [#allocation3]  }
   0x5   :  { %s834_s17 = smov [#allocation5]  }
   0x6   :  { %s28_s18 = sshll.u32 %s834_s17, 4  ;;  %s29_s18 = int_to_ptr.vmem [resolvable:$true] %s28_s18 }
   0x7   :  { %31 = dma.hbm_to_vmem [thread:$0]  %s27_s16, 256, %s29_s18, [#allocation6]  }
   0x8   :  { %827 = dma.done.wait [#allocation3], 256  }
   0x9   :  { %828 = vsyncadd [#allocation3], 4294967040 }
   0xa   :  { %829 = dma.done.wait [#allocation6], 256  }
   0xb   :  { %830 = vsyncadd [#allocation6], 4294967040  ;;  %v40_v0 = vld [vmem:[#allocation2] sm:$0xff]  ;;  %v41_v1 = vld [vmem:[#allocation2 + $0x8] sm:$0xff]  ;;  %v835_v12 = vmov 0   ;;  %s836_s0 = smov [#allocation7]  }
   0xc   :  { %v42_v2 = vld [vmem:[#allocation5] sm:$0xff]  ;;  %v43_v3 = vld [vmem:[#allocation5 + $0x8] sm:$0xff]  ;;  %s736_s1 = sshll.u32 %s836_s0, 4  ;;  %s738_s21 = sshll.u32 %s998_s2, 4  ;;  %s737_s1 = int_to_ptr.vmem [resolvable:$true] %s736_s1  ;;  %s739_s21 = int_to_ptr.hbm [resolvable:$true] %s738_s21 }
   0xd   :  { %v44_v4 = vmul.f32 %v42_v2, %v40_v0  ;;  %v45_v5 = vmul.f32 %v43_v3, %v41_v1 }
   0xf   :  { %v48_v6 = vshra.s32 %v44_v4, 31  ;;  %v49_v7 = vshra.s32 %v45_v5, 31 }
  0x11   :  { %v50_v8 = vand.u32 2147483647, %v48_v6  ;;  %v51_v9 = vand.u32 2147483647, %v49_v7 }
  0x13   :  { %v858_v10 = vxor.u32 %v50_v8, %v44_v4  ;;  %v860_v11 = vxor.u32 %v51_v9, %v45_v5 }
  0x15   :  { %vm54_vm0 = vcmp.ge.s32.totalorder %v858_v10, 0  ;;  %vm55_vm1 = vcmp.ge.s32.totalorder %v860_v11, 0 }
  0x16   :  { %v56_v13 = vsel %vm54_vm0, 1, %v835_v12  ;;  %v57_v14 = vsel %vm55_vm1, 1, %v835_v12 }
  0x17   :  { %v58_v15 = vadd.s32 %v57_v14, %v56_v13 }
  0x19   :  { %v60_v16 = vshrl.u32 %v58_v15, 16  ;;  %v59_v18 = vand.u32 65535, %v58_v15 }
  0x1b   :  { %v62_v17 = vcvt.s32.f32 %v60_v16  ;;  %v61_v19 = vcvt.s32.f32 %v59_v18 }
  0x1d   :  { %65 = vadd.xlane.f32.xlu0 %v62_v17 }
  0x25   :  { %63 = vadd.xlane.f32.xlu0 %v61_v19 }
  0x90   :  { %v66_v20 = vpop.xlane.xlu0 %65 }
  0x91   :  { %v68_v21 = vcvt.f32.s32 %v66_v20 }
  0x93   :  { %v69_v23 = vshll.u32 %v68_v21, 16 }
  0x98   :  { %v64_v22 = vpop.xlane.xlu0 %63 }
  0x99   :  { %v67_v24 = vcvt.f32.s32 %v64_v22 }
  0x9b   :  { %v70_v25 = vadd.s32 %v69_v23, %v67_v24 }
  0x9d   :  { %vm71_vm2 = vcmp.ge.s32.totalorder %v70_v25, 25 }
  0x9e   :  { %v72_v26 = vsel %vm71_vm2, 2147483648, %v835_v12 }
  0x9f   :  { %v73_v27 = vor.u32 1073741824, %v72_v26 }
  0xa1   :  { %v74_v28 = vxor.u32 2147483648, %v73_v27 }
  0xa3   :  { %vm75_vm3 = vcmp.ge.s32.totalorder %v858_v10, %v74_v28  ;;  %vm76_vm4 = vcmp.ge.s32.totalorder %v860_v11, %v74_v28 }
  0xa4   :  { %v77_v29 = vsel %vm75_vm3, 1, %v835_v12  ;;  %v78_v30 = vsel %vm76_vm4, 1, %v835_v12 }
  0xa5   :  { %v79_v31 = vadd.s32 %v78_v30, %v77_v29 }
  0xa7   :  { %v81_v32 = vshrl.u32 %v79_v31, 16  ;;  %v80_v34 = vand.u32 65535, %v79_v31 }
  0xa9   :  { %v83_v33 = vcvt.s32.f32 %v81_v32  ;;  %v82_v35 = vcvt.s32.f32 %v80_v34 }
  0xab   :  { %86 = vadd.xlane.f32.xlu1 %v83_v33 }
  0xb3   :  { %84 = vadd.xlane.f32.xlu1 %v82_v35 }
 0x11e   :  { %v87_v36 = vpop.xlane.xlu1 %86 }
 0x11f   :  { %v89_v37 = vcvt.f32.s32 %v87_v36 }
 0x121   :  { %v90_v39 = vshll.u32 %v89_v37, 16 }
 0x126   :  { %v85_v38 = vpop.xlane.xlu1 %84 }
 0x127   :  { %v88_v40 = vcvt.f32.s32 %v85_v38 }
 0x129   :  { %v91_v41 = vadd.s32 %v90_v39, %v88_v40 }
 0x12b   :  { %vm92_vm5 = vcmp.ge.s32.totalorder %v91_v41, 25 }
 0x12c   :  { %v93_v42 = vsel %vm92_vm5, %v73_v27, %v72_v26 }
 0x12d   :  { %v94_v43 = vor.u32 536870912, %v93_v42 }
 0x12f   :  { %v95_v44 = vxor.u32 2147483648, %v94_v43 }
 0x131   :  { %vm96_vm6 = vcmp.ge.s32.totalorder %v858_v10, %v95_v44  ;;  %vm97_vm7 = vcmp.ge.s32.totalorder %v860_v11, %v95_v44 }
 0x132   :  { %v98_v45 = vsel %vm96_vm6, 1, %v835_v12  ;;  %v99_v46 = vsel %vm97_vm7, 1, %v835_v12 }
 0x133   :  { %v100_v47 = vadd.s32 %v99_v46, %v98_v45 }
 0x135   :  { %v102_v48 = vshrl.u32 %v100_v47, 16  ;;  %v101_v50 = vand.u32 65535, %v100_v47 }
 0x137   :  { %v104_v49 = vcvt.s32.f32 %v102_v48  ;;  %v103_v51 = vcvt.s32.f32 %v101_v50 }
 0x139   :  { %107 = vadd.xlane.f32.xlu2 %v104_v49 }
 0x141   :  { %105 = vadd.xlane.f32.xlu2 %v103_v51 }
 0x1ac   :  { %v108_v52 = vpop.xlane.xlu2 %107 }
 0x1ad   :  { %v110_v53 = vcvt.f32.s32 %v108_v52 }
 0x1af   :  { %v111_v55 = vshll.u32 %v110_v53, 16 }
 0x1b4   :  { %v106_v54 = vpop.xlane.xlu2 %105 }
 0x1b5   :  { %v109_v56 = vcvt.f32.s32 %v106_v54 }
 0x1b7   :  { %v112_v57 = vadd.s32 %v111_v55, %v109_v56 }
 0x1b9   :  { %vm113_vm8 = vcmp.ge.s32.totalorder %v112_v57, 25 }
 0x1ba   :  { %v114_v58 = vsel %vm113_vm8, %v94_v43, %v93_v42 }
 0x1bb   :  { %v115_v59 = vor.u32 268435456, %v114_v58 }
 0x1bd   :  { %v116_v60 = vxor.u32 2147483648, %v115_v59 }
 0x1bf   :  { %vm117_vm9 = vcmp.ge.s32.totalorder %v858_v10, %v116_v60  ;;  %vm118_vm10 = vcmp.ge.s32.totalorder %v860_v11, %v116_v60 }
 0x1c0   :  { %v119_v61 = vsel %vm117_vm9, 1, %v835_v12  ;;  %v120_v62 = vsel %vm118_vm10, 1, %v835_v12 }
 0x1c1   :  { %v121_v63 = vadd.s32 %v120_v62, %v119_v61 }
 0x1c3   :  { %v123_v0 = vshrl.u32 %v121_v63, 16  ;;  %v122_v1 = vand.u32 65535, %v121_v63 }
 0x1c5   :  { %v125_v2 = vcvt.s32.f32 %v123_v0  ;;  %v124_v3 = vcvt.s32.f32 %v122_v1 }
 0x1c7   :  { %128 = vadd.xlane.f32.xlu0 %v125_v2  ;;  %126 = vadd.xlane.f32.xlu1 %v124_v3 }
 0x23a   :  { %v129_v4 = vpop.xlane.xlu0 %128  ;;  %v127_v5 = vpop.xlane.xlu1 %126 }
 0x23b   :  { %v131_v6 = vcvt.f32.s32 %v129_v4  ;;  %v130_v8 = vcvt.f32.s32 %v127_v5 }
 0x23d   :  { %v132_v7 = vshll.u32 %v131_v6, 16 }
 0x23f   :  { %v133_v9 = vadd.s32 %v132_v7, %v130_v8 }
 0x241   :  { %vm134_vm11 = vcmp.ge.s32.totalorder %v133_v9, 25 }
 0x242   :  { %v135_v13 = vsel %vm134_vm11, %v115_v59, %v114_v58 }
 0x243   :  { %v136_v14 = vor.u32 134217728, %v135_v13 }
 0x245   :  { %v137_v15 = vxor.u32 2147483648, %v136_v14 }
 0x247   :  { %vm138_vm12 = vcmp.ge.s32.totalorder %v858_v10, %v137_v15  ;;  %vm139_vm13 = vcmp.ge.s32.totalorder %v860_v11, %v137_v15 }
 0x248   :  { %v140_v16 = vsel %vm138_vm12, 1, %v835_v12  ;;  %v141_v17 = vsel %vm139_vm13, 1, %v835_v12 }
 0x249   :  { %v142_v18 = vadd.s32 %v141_v17, %v140_v16 }
 0x24b   :  { %v144_v19 = vshrl.u32 %v142_v18, 16  ;;  %v143_v20 = vand.u32 65535, %v142_v18 }
 0x24d   :  { %v146_v21 = vcvt.s32.f32 %v144_v19  ;;  %v145_v22 = vcvt.s32.f32 %v143_v20 }
 0x24f   :  { %149 = vadd.xlane.f32.xlu2 %v146_v21  ;;  %147 = vadd.xlane.f32.xlu0 %v145_v22 }
 0x2c2   :  { %v150_v23 = vpop.xlane.xlu2 %149  ;;  %v148_v24 = vpop.xlane.xlu0 %147 }
 0x2c3   :  { %v152_v25 = vcvt.f32.s32 %v150_v23  ;;  %v151_v27 = vcvt.f32.s32 %v148_v24 }
 0x2c5   :  { %v153_v26 = vshll.u32 %v152_v25, 16 }
 0x2c7   :  { %v154_v28 = vadd.s32 %v153_v26, %v151_v27 }
 0x2c9   :  { %vm155_vm14 = vcmp.ge.s32.totalorder %v154_v28, 25 }
 0x2ca   :  { %v156_v29 = vsel %vm155_vm14, %v136_v14, %v135_v13 }
 0x2cb   :  { %v157_v30 = vor.u32 67108864, %v156_v29 }
 0x2cd   :  { %v158_v31 = vxor.u32 2147483648, %v157_v30 }
 0x2cf   :  { %vm159_vm15 = vcmp.ge.s32.totalorder %v858_v10, %v158_v31  ;;  %vm160_vm0 = vcmp.ge.s32.totalorder %v860_v11, %v158_v31 }
 0x2d0   :  { %v161_v32 = vsel %vm159_vm15, 1, %v835_v12  ;;  %v162_v33 = vsel %vm160_vm0, 1, %v835_v12 }
 0x2d1   :  { %v163_v34 = vadd.s32 %v162_v33, %v161_v32 }
 0x2d3   :  { %v165_v35 = vshrl.u32 %v163_v34, 16  ;;  %v164_v36 = vand.u32 65535, %v163_v34 }
 0x2d5   :  { %v167_v37 = vcvt.s32.f32 %v165_v35  ;;  %v166_v38 = vcvt.s32.f32 %v164_v36 }
 0x2d7   :  { %170 = vadd.xlane.f32.xlu1 %v167_v37  ;;  %168 = vadd.xlane.f32.xlu2 %v166_v38 }
 0x34a   :  { %v171_v39 = vpop.xlane.xlu1 %170  ;;  %v169_v40 = vpop.xlane.xlu2 %168 }
 0x34b   :  { %v173_v41 = vcvt.f32.s32 %v171_v39  ;;  %v172_v43 = vcvt.f32.s32 %v169_v40 }
 0x34d   :  { %v174_v42 = vshll.u32 %v173_v41, 16 }
 0x34f   :  { %v175_v44 = vadd.s32 %v174_v42, %v172_v43 }
 0x351   :  { %vm176_vm1 = vcmp.ge.s32.totalorder %v175_v44, 25 }
 0x352   :  { %v177_v45 = vsel %vm176_vm1, %v157_v30, %v156_v29 }
 0x353   :  { %v178_v46 = vor.u32 33554432, %v177_v45 }
 0x355   :  { %v179_v47 = vxor.u32 2147483648, %v178_v46 }
 0x357   :  { %vm180_vm2 = vcmp.ge.s32.totalorder %v858_v10, %v179_v47  ;;  %vm181_vm3 = vcmp.ge.s32.totalorder %v860_v11, %v179_v47 }
 0x358   :  { %v182_v48 = vsel %vm180_vm2, 1, %v835_v12  ;;  %v183_v49 = vsel %vm181_vm3, 1, %v835_v12 }
 0x359   :  { %v184_v50 = vadd.s32 %v183_v49, %v182_v48 }
 0x35b   :  { %v186_v51 = vshrl.u32 %v184_v50, 16  ;;  %v185_v52 = vand.u32 65535, %v184_v50 }
 0x35d   :  { %v188_v53 = vcvt.s32.f32 %v186_v51  ;;  %v187_v54 = vcvt.s32.f32 %v185_v52 }
 0x35f   :  { %191 = vadd.xlane.f32.xlu0 %v188_v53  ;;  %189 = vadd.xlane.f32.xlu1 %v187_v54 }
 0x3d2   :  { %v192_v55 = vpop.xlane.xlu0 %191  ;;  %v190_v56 = vpop.xlane.xlu1 %189 }
 0x3d3   :  { %v194_v57 = vcvt.f32.s32 %v192_v55  ;;  %v193_v59 = vcvt.f32.s32 %v190_v56 }
 0x3d5   :  { %v195_v58 = vshll.u32 %v194_v57, 16 }
 0x3d7   :  { %v196_v60 = vadd.s32 %v195_v58, %v193_v59 }
 0x3d9   :  { %vm197_vm4 = vcmp.ge.s32.totalorder %v196_v60, 25 }
 0x3da   :  { %v198_v61 = vsel %vm197_vm4, %v178_v46, %v177_v45 }
 0x3db   :  { %v199_v62 = vor.u32 16777216, %v198_v61 }
 0x3dd   :  { %v200_v63 = vxor.u32 2147483648, %v199_v62 }
 0x3df   :  { %vm201_vm5 = vcmp.ge.s32.totalorder %v858_v10, %v200_v63  ;;  %vm202_vm6 = vcmp.ge.s32.totalorder %v860_v11, %v200_v63 }
 0x3e0   :  { %v203_v0 = vsel %vm201_vm5, 1, %v835_v12  ;;  %v204_v1 = vsel %vm202_vm6, 1, %v835_v12 }
 0x3e1   :  { %v205_v2 = vadd.s32 %v204_v1, %v203_v0 }
 0x3e3   :  { %v207_v3 = vshrl.u32 %v205_v2, 16  ;;  %v206_v4 = vand.u32 65535, %v205_v2 }
 0x3e5   :  { %v209_v5 = vcvt.s32.f32 %v207_v3  ;;  %v208_v6 = vcvt.s32.f32 %v206_v4 }
 0x3e7   :  { %212 = vadd.xlane.f32.xlu2 %v209_v5  ;;  %210 = vadd.xlane.f32.xlu0 %v208_v6 }
 0x45a   :  { %v213_v7 = vpop.xlane.xlu2 %212  ;;  %v211_v8 = vpop.xlane.xlu0 %210 }
 0x45b   :  { %v215_v9 = vcvt.f32.s32 %v213_v7  ;;  %v214_v14 = vcvt.f32.s32 %v211_v8 }
 0x45d   :  { %v216_v13 = vshll.u32 %v215_v9, 16 }
 0x45f   :  { %v217_v15 = vadd.s32 %v216_v13, %v214_v14 }
 0x461   :  { %vm218_vm7 = vcmp.ge.s32.totalorder %v217_v15, 25 }
 0x462   :  { %v219_v16 = vsel %vm218_vm7, %v199_v62, %v198_v61 }
 0x463   :  { %v220_v17 = vor.u32 8388608, %v219_v16 }
 0x465   :  { %v221_v18 = vxor.u32 2147483648, %v220_v17 }
 0x467   :  { %vm222_vm8 = vcmp.ge.s32.totalorder %v858_v10, %v221_v18  ;;  %vm223_vm9 = vcmp.ge.s32.totalorder %v860_v11, %v221_v18 }
 0x468   :  { %v224_v19 = vsel %vm222_vm8, 1, %v835_v12  ;;  %v225_v20 = vsel %vm223_vm9, 1, %v835_v12 }
 0x469   :  { %v226_v21 = vadd.s32 %v225_v20, %v224_v19 }
 0x46b   :  { %v228_v22 = vshrl.u32 %v226_v21, 16  ;;  %v227_v23 = vand.u32 65535, %v226_v21 }
 0x46d   :  { %v230_v24 = vcvt.s32.f32 %v228_v22  ;;  %v229_v25 = vcvt.s32.f32 %v227_v23 }
 0x46f   :  { %233 = vadd.xlane.f32.xlu1 %v230_v24  ;;  %231 = vadd.xlane.f32.xlu2 %v229_v25 }
 0x4e2   :  { %v234_v26 = vpop.xlane.xlu1 %233  ;;  %v232_v27 = vpop.xlane.xlu2 %231 }
 0x4e3   :  { %v236_v28 = vcvt.f32.s32 %v234_v26  ;;  %v235_v30 = vcvt.f32.s32 %v232_v27 }
 0x4e5   :  { %v237_v29 = vshll.u32 %v236_v28, 16 }
 0x4e7   :  { %v238_v31 = vadd.s32 %v237_v29, %v235_v30 }
 0x4e9   :  { %vm239_vm10 = vcmp.ge.s32.totalorder %v238_v31, 25 }
 0x4ea   :  { %v240_v32 = vsel %vm239_vm10, %v220_v17, %v219_v16 }
 0x4eb   :  { %v241_v33 = vor.u32 4194304, %v240_v32 }
 0x4ed   :  { %v242_v34 = vxor.u32 2147483648, %v241_v33 }
 0x4ef   :  { %vm243_vm11 = vcmp.ge.s32.totalorder %v858_v10, %v242_v34  ;;  %vm244_vm12 = vcmp.ge.s32.totalorder %v860_v11, %v242_v34 }
 0x4f0   :  { %v245_v35 = vsel %vm243_vm11, 1, %v835_v12  ;;  %v246_v36 = vsel %vm244_vm12, 1, %v835_v12 }
 0x4f1   :  { %v247_v37 = vadd.s32 %v246_v36, %v245_v35 }
 0x4f3   :  { %v249_v38 = vshrl.u32 %v247_v37, 16  ;;  %v248_v39 = vand.u32 65535, %v247_v37 }
 0x4f5   :  { %v251_v40 = vcvt.s32.f32 %v249_v38  ;;  %v250_v41 = vcvt.s32.f32 %v248_v39 }
 0x4f7   :  { %254 = vadd.xlane.f32.xlu0 %v251_v40  ;;  %252 = vadd.xlane.f32.xlu1 %v250_v41 }
 0x56a   :  { %v255_v42 = vpop.xlane.xlu0 %254  ;;  %v253_v43 = vpop.xlane.xlu1 %252 }
 0x56b   :  { %v257_v44 = vcvt.f32.s32 %v255_v42  ;;  %v256_v46 = vcvt.f32.s32 %v253_v43 }
 0x56d   :  { %v258_v45 = vshll.u32 %v257_v44, 16 }
 0x56f   :  { %v259_v47 = vadd.s32 %v258_v45, %v256_v46 }
 0x571   :  { %vm260_vm13 = vcmp.ge.s32.totalorder %v259_v47, 25 }
 0x572   :  { %v261_v48 = vsel %vm260_vm13, %v241_v33, %v240_v32 }
 0x573   :  { %v262_v49 = vor.u32 2097152, %v261_v48 }
 0x575   :  { %v263_v50 = vxor.u32 2147483648, %v262_v49 }
 0x577   :  { %vm264_vm14 = vcmp.ge.s32.totalorder %v858_v10, %v263_v50  ;;  %vm265_vm15 = vcmp.ge.s32.totalorder %v860_v11, %v263_v50 }
 0x578   :  { %v266_v51 = vsel %vm264_vm14, 1, %v835_v12  ;;  %v267_v52 = vsel %vm265_vm15, 1, %v835_v12 }
 0x579   :  { %v268_v53 = vadd.s32 %v267_v52, %v266_v51 }
 0x57b   :  { %v270_v54 = vshrl.u32 %v268_v53, 16  ;;  %v269_v55 = vand.u32 65535, %v268_v53 }
 0x57d   :  { %v272_v56 = vcvt.s32.f32 %v270_v54  ;;  %v271_v57 = vcvt.s32.f32 %v269_v55 }
 0x57f   :  { %275 = vadd.xlane.f32.xlu2 %v272_v56  ;;  %273 = vadd.xlane.f32.xlu0 %v271_v57 }
 0x5f2   :  { %v276_v58 = vpop.xlane.xlu2 %275  ;;  %v274_v59 = vpop.xlane.xlu0 %273 }
 0x5f3   :  { %v278_v60 = vcvt.f32.s32 %v276_v58  ;;  %v277_v62 = vcvt.f32.s32 %v274_v59 }
 0x5f5   :  { %v279_v61 = vshll.u32 %v278_v60, 16 }
 0x5f7   :  { %v280_v63 = vadd.s32 %v279_v61, %v277_v62 }
 0x5f9   :  { %vm281_vm0 = vcmp.ge.s32.totalorder %v280_v63, 25 }
 0x5fa   :  { %v282_v0 = vsel %vm281_vm0, %v262_v49, %v261_v48 }
 0x5fb   :  { %v283_v1 = vor.u32 1048576, %v282_v0 }
 0x5fd   :  { %v284_v2 = vxor.u32 2147483648, %v283_v1 }
 0x5ff   :  { %vm285_vm1 = vcmp.ge.s32.totalorder %v858_v10, %v284_v2  ;;  %vm286_vm2 = vcmp.ge.s32.totalorder %v860_v11, %v284_v2 }
 0x600   :  { %v287_v3 = vsel %vm285_vm1, 1, %v835_v12  ;;  %v288_v4 = vsel %vm286_vm2, 1, %v835_v12 }
 0x601   :  { %v289_v5 = vadd.s32 %v288_v4, %v287_v3 }
 0x603   :  { %v291_v6 = vshrl.u32 %v289_v5, 16  ;;  %v290_v7 = vand.u32 65535, %v289_v5 }
 0x605   :  { %v293_v8 = vcvt.s32.f32 %v291_v6  ;;  %v292_v9 = vcvt.s32.f32 %v290_v7 }
 0x607   :  { %296 = vadd.xlane.f32.xlu1 %v293_v8  ;;  %294 = vadd.xlane.f32.xlu2 %v292_v9 }
 0x67a   :  { %v297_v13 = vpop.xlane.xlu1 %296  ;;  %v295_v14 = vpop.xlane.xlu2 %294 }
 0x67b   :  { %v299_v15 = vcvt.f32.s32 %v297_v13  ;;  %v298_v17 = vcvt.f32.s32 %v295_v14 }
 0x67d   :  { %v300_v16 = vshll.u32 %v299_v15, 16 }
 0x67f   :  { %v301_v18 = vadd.s32 %v300_v16, %v298_v17 }
 0x681   :  { %vm302_vm3 = vcmp.ge.s32.totalorder %v301_v18, 25 }
 0x682   :  { %v303_v19 = vsel %vm302_vm3, %v283_v1, %v282_v0 }
 0x683   :  { %v304_v20 = vor.u32 524288, %v303_v19 }
 0x685   :  { %v305_v21 = vxor.u32 2147483648, %v304_v20 }
 0x687   :  { %vm306_vm4 = vcmp.ge.s32.totalorder %v858_v10, %v305_v21  ;;  %vm307_vm5 = vcmp.ge.s32.totalorder %v860_v11, %v305_v21 }
 0x688   :  { %v308_v22 = vsel %vm306_vm4, 1, %v835_v12  ;;  %v309_v23 = vsel %vm307_vm5, 1, %v835_v12 }
 0x689   :  { %v310_v24 = vadd.s32 %v309_v23, %v308_v22 }
 0x68b   :  { %v312_v25 = vshrl.u32 %v310_v24, 16  ;;  %v311_v26 = vand.u32 65535, %v310_v24 }
 0x68d   :  { %v314_v27 = vcvt.s32.f32 %v312_v25  ;;  %v313_v28 = vcvt.s32.f32 %v311_v26 }
 0x68f   :  { %317 = vadd.xlane.f32.xlu0 %v314_v27  ;;  %315 = vadd.xlane.f32.xlu1 %v313_v28 }
 0x702   :  { %v318_v29 = vpop.xlane.xlu0 %317  ;;  %v316_v30 = vpop.xlane.xlu1 %315 }
 0x703   :  { %v320_v31 = vcvt.f32.s32 %v318_v29  ;;  %v319_v33 = vcvt.f32.s32 %v316_v30 }
 0x705   :  { %v321_v32 = vshll.u32 %v320_v31, 16 }
 0x707   :  { %v322_v34 = vadd.s32 %v321_v32, %v319_v33 }
 0x709   :  { %vm323_vm6 = vcmp.ge.s32.totalorder %v322_v34, 25 }
 0x70a   :  { %v324_v35 = vsel %vm323_vm6, %v304_v20, %v303_v19 }
 0x70b   :  { %v325_v36 = vor.u32 262144, %v324_v35 }
 0x70d   :  { %v326_v37 = vxor.u32 2147483648, %v325_v36 }
 0x70f   :  { %vm327_vm7 = vcmp.ge.s32.totalorder %v858_v10, %v326_v37  ;;  %vm328_vm8 = vcmp.ge.s32.totalorder %v860_v11, %v326_v37 }
 0x710   :  { %v329_v38 = vsel %vm327_vm7, 1, %v835_v12  ;;  %v330_v39 = vsel %vm328_vm8, 1, %v835_v12 }
 0x711   :  { %v331_v40 = vadd.s32 %v330_v39, %v329_v38 }
 0x713   :  { %v333_v41 = vshrl.u32 %v331_v40, 16  ;;  %v332_v42 = vand.u32 65535, %v331_v40 }
 0x715   :  { %v335_v43 = vcvt.s32.f32 %v333_v41  ;;  %v334_v44 = vcvt.s32.f32 %v332_v42 }
 0x717   :  { %338 = vadd.xlane.f32.xlu2 %v335_v43  ;;  %336 = vadd.xlane.f32.xlu0 %v334_v44 }
 0x78a   :  { %v339_v45 = vpop.xlane.xlu2 %338  ;;  %v337_v46 = vpop.xlane.xlu0 %336 }
 0x78b   :  { %v341_v47 = vcvt.f32.s32 %v339_v45  ;;  %v340_v49 = vcvt.f32.s32 %v337_v46 }
 0x78d   :  { %v342_v48 = vshll.u32 %v341_v47, 16 }
 0x78f   :  { %v343_v50 = vadd.s32 %v342_v48, %v340_v49 }
 0x791   :  { %vm344_vm9 = vcmp.ge.s32.totalorder %v343_v50, 25 }
 0x792   :  { %v345_v51 = vsel %vm344_vm9, %v325_v36, %v324_v35 }
 0x793   :  { %v346_v52 = vor.u32 131072, %v345_v51 }
 0x795   :  { %v347_v53 = vxor.u32 2147483648, %v346_v52 }
 0x797   :  { %vm348_vm10 = vcmp.ge.s32.totalorder %v858_v10, %v347_v53  ;;  %vm349_vm11 = vcmp.ge.s32.totalorder %v860_v11, %v347_v53 }
 0x798   :  { %v350_v54 = vsel %vm348_vm10, 1, %v835_v12  ;;  %v351_v55 = vsel %vm349_vm11, 1, %v835_v12 }
 0x799   :  { %v352_v56 = vadd.s32 %v351_v55, %v350_v54 }
 0x79b   :  { %v354_v57 = vshrl.u32 %v352_v56, 16  ;;  %v353_v58 = vand.u32 65535, %v352_v56 }
 0x79d   :  { %v356_v59 = vcvt.s32.f32 %v354_v57  ;;  %v355_v60 = vcvt.s32.f32 %v353_v58 }
 0x79f   :  { %359 = vadd.xlane.f32.xlu1 %v356_v59  ;;  %357 = vadd.xlane.f32.xlu2 %v355_v60 }
 0x812   :  { %v360_v61 = vpop.xlane.xlu1 %359  ;;  %v358_v62 = vpop.xlane.xlu2 %357 }
 0x813   :  { %v362_v63 = vcvt.f32.s32 %v360_v61  ;;  %v361_v1 = vcvt.f32.s32 %v358_v62 }
 0x815   :  { %v363_v0 = vshll.u32 %v362_v63, 16 }
 0x817   :  { %v364_v2 = vadd.s32 %v363_v0, %v361_v1 }
 0x819   :  { %vm365_vm12 = vcmp.ge.s32.totalorder %v364_v2, 25 }
 0x81a   :  { %v366_v3 = vsel %vm365_vm12, %v346_v52, %v345_v51 }
 0x81b   :  { %v367_v4 = vor.u32 65536, %v366_v3 }
 0x81d   :  { %v368_v5 = vxor.u32 2147483648, %v367_v4 }
 0x81f   :  { %vm369_vm13 = vcmp.ge.s32.totalorder %v858_v10, %v368_v5  ;;  %vm370_vm14 = vcmp.ge.s32.totalorder %v860_v11, %v368_v5 }
 0x820   :  { %v371_v6 = vsel %vm369_vm13, 1, %v835_v12  ;;  %v372_v7 = vsel %vm370_vm14, 1, %v835_v12 }
 0x821   :  { %v373_v8 = vadd.s32 %v372_v7, %v371_v6 }
 0x823   :  { %v375_v9 = vshrl.u32 %v373_v8, 16  ;;  %v374_v13 = vand.u32 65535, %v373_v8 }
 0x825   :  { %v377_v14 = vcvt.s32.f32 %v375_v9  ;;  %v376_v15 = vcvt.s32.f32 %v374_v13 }
 0x827   :  { %380 = vadd.xlane.f32.xlu0 %v377_v14  ;;  %378 = vadd.xlane.f32.xlu1 %v376_v15 }
 0x89a   :  { %v381_v16 = vpop.xlane.xlu0 %380  ;;  %v379_v17 = vpop.xlane.xlu1 %378 }
 0x89b   :  { %v383_v18 = vcvt.f32.s32 %v381_v16  ;;  %v382_v20 = vcvt.f32.s32 %v379_v17 }
 0x89d   :  { %v384_v19 = vshll.u32 %v383_v18, 16 }
 0x89f   :  { %v385_v21 = vadd.s32 %v384_v19, %v382_v20 }
 0x8a1   :  { %vm386_vm15 = vcmp.ge.s32.totalorder %v385_v21, 25 }
 0x8a2   :  { %v387_v22 = vsel %vm386_vm15, %v367_v4, %v366_v3 }
 0x8a3   :  { %v388_v23 = vor.u32 32768, %v387_v22 }
 0x8a5   :  { %v389_v24 = vxor.u32 2147483648, %v388_v23 }
 0x8a7   :  { %vm390_vm0 = vcmp.ge.s32.totalorder %v858_v10, %v389_v24  ;;  %vm391_vm1 = vcmp.ge.s32.totalorder %v860_v11, %v389_v24 }
 0x8a8   :  { %v392_v25 = vsel %vm390_vm0, 1, %v835_v12  ;;  %v393_v26 = vsel %vm391_vm1, 1, %v835_v12 }
 0x8a9   :  { %v394_v27 = vadd.s32 %v393_v26, %v392_v25 }
 0x8ab   :  { %v396_v28 = vshrl.u32 %v394_v27, 16  ;;  %v395_v29 = vand.u32 65535, %v394_v27 }
 0x8ad   :  { %v398_v30 = vcvt.s32.f32 %v396_v28  ;;  %v397_v31 = vcvt.s32.f32 %v395_v29 }
 0x8af   :  { %401 = vadd.xlane.f32.xlu2 %v398_v30  ;;  %399 = vadd.xlane.f32.xlu0 %v397_v31 }
 0x922   :  { %v402_v32 = vpop.xlane.xlu2 %401  ;;  %v400_v33 = vpop.xlane.xlu0 %399 }
 0x923   :  { %v404_v34 = vcvt.f32.s32 %v402_v32  ;;  %v403_v36 = vcvt.f32.s32 %v400_v33 }
 0x925   :  { %v405_v35 = vshll.u32 %v404_v34, 16 }
 0x927   :  { %v406_v37 = vadd.s32 %v405_v35, %v403_v36 }
 0x929   :  { %vm407_vm2 = vcmp.ge.s32.totalorder %v406_v37, 25 }
 0x92a   :  { %v408_v38 = vsel %vm407_vm2, %v388_v23, %v387_v22 }
 0x92b   :  { %v409_v39 = vor.u32 16384, %v408_v38 }
 0x92d   :  { %v410_v40 = vxor.u32 2147483648, %v409_v39 }
 0x92f   :  { %vm411_vm3 = vcmp.ge.s32.totalorder %v858_v10, %v410_v40  ;;  %vm412_vm4 = vcmp.ge.s32.totalorder %v860_v11, %v410_v40 }
 0x930   :  { %v413_v41 = vsel %vm411_vm3, 1, %v835_v12  ;;  %v414_v42 = vsel %vm412_vm4, 1, %v835_v12 }
 0x931   :  { %v415_v43 = vadd.s32 %v414_v42, %v413_v41 }
 0x933   :  { %v417_v44 = vshrl.u32 %v415_v43, 16  ;;  %v416_v45 = vand.u32 65535, %v415_v43 }
 0x935   :  { %v419_v46 = vcvt.s32.f32 %v417_v44  ;;  %v418_v47 = vcvt.s32.f32 %v416_v45 }
 0x937   :  { %422 = vadd.xlane.f32.xlu1 %v419_v46  ;;  %420 = vadd.xlane.f32.xlu2 %v418_v47 }
 0x9aa   :  { %v423_v48 = vpop.xlane.xlu1 %422  ;;  %v421_v49 = vpop.xlane.xlu2 %420 }
 0x9ab   :  { %v425_v50 = vcvt.f32.s32 %v423_v48  ;;  %v424_v52 = vcvt.f32.s32 %v421_v49 }
 0x9ad   :  { %v426_v51 = vshll.u32 %v425_v50, 16 }
 0x9af   :  { %v427_v53 = vadd.s32 %v426_v51, %v424_v52 }
 0x9b1   :  { %vm428_vm5 = vcmp.ge.s32.totalorder %v427_v53, 25 }
 0x9b2   :  { %v429_v54 = vsel %vm428_vm5, %v409_v39, %v408_v38 }
 0x9b3   :  { %v430_v55 = vor.u32 8192, %v429_v54 }
 0x9b5   :  { %v431_v56 = vxor.u32 2147483648, %v430_v55 }
 0x9b7   :  { %vm432_vm6 = vcmp.ge.s32.totalorder %v858_v10, %v431_v56  ;;  %vm433_vm7 = vcmp.ge.s32.totalorder %v860_v11, %v431_v56 }
 0x9b8   :  { %v434_v57 = vsel %vm432_vm6, 1, %v835_v12  ;;  %v435_v58 = vsel %vm433_vm7, 1, %v835_v12 }
 0x9b9   :  { %v436_v59 = vadd.s32 %v435_v58, %v434_v57 }
 0x9bb   :  { %v438_v60 = vshrl.u32 %v436_v59, 16  ;;  %v437_v61 = vand.u32 65535, %v436_v59 }
 0x9bd   :  { %v440_v62 = vcvt.s32.f32 %v438_v60  ;;  %v439_v63 = vcvt.s32.f32 %v437_v61 }
 0x9bf   :  { %443 = vadd.xlane.f32.xlu0 %v440_v62  ;;  %441 = vadd.xlane.f32.xlu1 %v439_v63 }
 0xa32   :  { %v444_v0 = vpop.xlane.xlu0 %443  ;;  %v442_v1 = vpop.xlane.xlu1 %441 }
 0xa33   :  { %v446_v2 = vcvt.f32.s32 %v444_v0  ;;  %v445_v4 = vcvt.f32.s32 %v442_v1 }
 0xa35   :  { %v447_v3 = vshll.u32 %v446_v2, 16 }
 0xa37   :  { %v448_v5 = vadd.s32 %v447_v3, %v445_v4 }
 0xa39   :  { %vm449_vm8 = vcmp.ge.s32.totalorder %v448_v5, 25 }
 0xa3a   :  { %v450_v6 = vsel %vm449_vm8, %v430_v55, %v429_v54 }
 0xa3b   :  { %v451_v7 = vor.u32 4096, %v450_v6 }
 0xa3d   :  { %v452_v8 = vxor.u32 2147483648, %v451_v7 }
 0xa3f   :  { %vm453_vm9 = vcmp.ge.s32.totalorder %v858_v10, %v452_v8  ;;  %vm454_vm10 = vcmp.ge.s32.totalorder %v860_v11, %v452_v8 }
 0xa40   :  { %v455_v9 = vsel %vm453_vm9, 1, %v835_v12  ;;  %v456_v13 = vsel %vm454_vm10, 1, %v835_v12 }
 0xa41   :  { %v457_v14 = vadd.s32 %v456_v13, %v455_v9 }
 0xa43   :  { %v459_v15 = vshrl.u32 %v457_v14, 16  ;;  %v458_v16 = vand.u32 65535, %v457_v14 }
 0xa45   :  { %v461_v17 = vcvt.s32.f32 %v459_v15  ;;  %v460_v18 = vcvt.s32.f32 %v458_v16 }
 0xa47   :  { %464 = vadd.xlane.f32.xlu2 %v461_v17  ;;  %462 = vadd.xlane.f32.xlu0 %v460_v18 }
 0xaba   :  { %v465_v19 = vpop.xlane.xlu2 %464  ;;  %v463_v20 = vpop.xlane.xlu0 %462 }
 0xabb   :  { %v467_v21 = vcvt.f32.s32 %v465_v19  ;;  %v466_v23 = vcvt.f32.s32 %v463_v20 }
 0xabd   :  { %v468_v22 = vshll.u32 %v467_v21, 16 }
 0xabf   :  { %v469_v24 = vadd.s32 %v468_v22, %v466_v23 }
 0xac1   :  { %vm470_vm11 = vcmp.ge.s32.totalorder %v469_v24, 25 }
 0xac2   :  { %v471_v25 = vsel %vm470_vm11, %v451_v7, %v450_v6 }
 0xac3   :  { %v472_v26 = vor.u32 2048, %v471_v25 }
 0xac5   :  { %v473_v27 = vxor.u32 2147483648, %v472_v26 }
 0xac7   :  { %vm474_vm12 = vcmp.ge.s32.totalorder %v858_v10, %v473_v27  ;;  %vm475_vm13 = vcmp.ge.s32.totalorder %v860_v11, %v473_v27 }
 0xac8   :  { %v476_v28 = vsel %vm474_vm12, 1, %v835_v12  ;;  %v477_v29 = vsel %vm475_vm13, 1, %v835_v12 }
 0xac9   :  { %v478_v30 = vadd.s32 %v477_v29, %v476_v28 }
 0xacb   :  { %v480_v31 = vshrl.u32 %v478_v30, 16  ;;  %v479_v32 = vand.u32 65535, %v478_v30 }
 0xacd   :  { %v482_v33 = vcvt.s32.f32 %v480_v31  ;;  %v481_v34 = vcvt.s32.f32 %v479_v32 }
 0xacf   :  { %485 = vadd.xlane.f32.xlu1 %v482_v33  ;;  %483 = vadd.xlane.f32.xlu2 %v481_v34 }
 0xb42   :  { %v486_v35 = vpop.xlane.xlu1 %485  ;;  %v484_v36 = vpop.xlane.xlu2 %483 }
 0xb43   :  { %v488_v37 = vcvt.f32.s32 %v486_v35  ;;  %v487_v39 = vcvt.f32.s32 %v484_v36 }
 0xb45   :  { %v489_v38 = vshll.u32 %v488_v37, 16 }
 0xb47   :  { %v490_v40 = vadd.s32 %v489_v38, %v487_v39 }
 0xb49   :  { %vm491_vm14 = vcmp.ge.s32.totalorder %v490_v40, 25 }
 0xb4a   :  { %v492_v41 = vsel %vm491_vm14, %v472_v26, %v471_v25 }
 0xb4b   :  { %v493_v42 = vor.u32 1024, %v492_v41 }
 0xb4d   :  { %v494_v43 = vxor.u32 2147483648, %v493_v42 }
 0xb4f   :  { %vm495_vm15 = vcmp.ge.s32.totalorder %v858_v10, %v494_v43  ;;  %vm496_vm0 = vcmp.ge.s32.totalorder %v860_v11, %v494_v43 }
 0xb50   :  { %v497_v44 = vsel %vm495_vm15, 1, %v835_v12  ;;  %v498_v45 = vsel %vm496_vm0, 1, %v835_v12 }
 0xb51   :  { %v499_v46 = vadd.s32 %v498_v45, %v497_v44 }
 0xb53   :  { %v501_v47 = vshrl.u32 %v499_v46, 16  ;;  %v500_v48 = vand.u32 65535, %v499_v46 }
 0xb55   :  { %v503_v49 = vcvt.s32.f32 %v501_v47  ;;  %v502_v50 = vcvt.s32.f32 %v500_v48 }
 0xb57   :  { %506 = vadd.xlane.f32.xlu0 %v503_v49  ;;  %504 = vadd.xlane.f32.xlu1 %v502_v50 }
 0xbca   :  { %v507_v51 = vpop.xlane.xlu0 %506  ;;  %v505_v52 = vpop.xlane.xlu1 %504 }
 0xbcb   :  { %v509_v53 = vcvt.f32.s32 %v507_v51  ;;  %v508_v55 = vcvt.f32.s32 %v505_v52 }
 0xbcd   :  { %v510_v54 = vshll.u32 %v509_v53, 16 }
 0xbcf   :  { %v511_v56 = vadd.s32 %v510_v54, %v508_v55 }
 0xbd1   :  { %vm512_vm1 = vcmp.ge.s32.totalorder %v511_v56, 25 }
 0xbd2   :  { %v513_v57 = vsel %vm512_vm1, %v493_v42, %v492_v41 }
 0xbd3   :  { %v514_v58 = vor.u32 512, %v513_v57 }
 0xbd5   :  { %v515_v59 = vxor.u32 2147483648, %v514_v58 }
 0xbd7   :  { %vm516_vm2 = vcmp.ge.s32.totalorder %v858_v10, %v515_v59  ;;  %vm517_vm3 = vcmp.ge.s32.totalorder %v860_v11, %v515_v59 }
 0xbd8   :  { %v518_v60 = vsel %vm516_vm2, 1, %v835_v12  ;;  %v519_v61 = vsel %vm517_vm3, 1, %v835_v12 }
 0xbd9   :  { %v520_v62 = vadd.s32 %v519_v61, %v518_v60 }
 0xbdb   :  { %v522_v63 = vshrl.u32 %v520_v62, 16  ;;  %v521_v0 = vand.u32 65535, %v520_v62 }
 0xbdd   :  { %v524_v1 = vcvt.s32.f32 %v522_v63  ;;  %v523_v2 = vcvt.s32.f32 %v521_v0 }
 0xbdf   :  { %527 = vadd.xlane.f32.xlu2 %v524_v1  ;;  %525 = vadd.xlane.f32.xlu0 %v523_v2 }
 0xc52   :  { %v528_v3 = vpop.xlane.xlu2 %527  ;;  %v526_v4 = vpop.xlane.xlu0 %525 }
 0xc53   :  { %v530_v5 = vcvt.f32.s32 %v528_v3  ;;  %v529_v7 = vcvt.f32.s32 %v526_v4 }
 0xc55   :  { %v531_v6 = vshll.u32 %v530_v5, 16 }
 0xc57   :  { %v532_v8 = vadd.s32 %v531_v6, %v529_v7 }
 0xc59   :  { %vm533_vm4 = vcmp.ge.s32.totalorder %v532_v8, 25 }
 0xc5a   :  { %v534_v9 = vsel %vm533_vm4, %v514_v58, %v513_v57 }
 0xc5b   :  { %v535_v13 = vor.u32 256, %v534_v9 }
 0xc5d   :  { %v536_v14 = vxor.u32 2147483648, %v535_v13 }
 0xc5f   :  { %vm537_vm5 = vcmp.ge.s32.totalorder %v858_v10, %v536_v14  ;;  %vm538_vm6 = vcmp.ge.s32.totalorder %v860_v11, %v536_v14 }
 0xc60   :  { %v539_v15 = vsel %vm537_vm5, 1, %v835_v12  ;;  %v540_v16 = vsel %vm538_vm6, 1, %v835_v12 }
 0xc61   :  { %v541_v17 = vadd.s32 %v540_v16, %v539_v15 }
 0xc63   :  { %v543_v18 = vshrl.u32 %v541_v17, 16  ;;  %v542_v19 = vand.u32 65535, %v541_v17 }
 0xc65   :  { %v545_v20 = vcvt.s32.f32 %v543_v18  ;;  %v544_v21 = vcvt.s32.f32 %v542_v19 }
 0xc67   :  { %548 = vadd.xlane.f32.xlu1 %v545_v20  ;;  %546 = vadd.xlane.f32.xlu2 %v544_v21 }
 0xcda   :  { %v549_v22 = vpop.xlane.xlu1 %548  ;;  %v547_v23 = vpop.xlane.xlu2 %546 }
 0xcdb   :  { %v551_v24 = vcvt.f32.s32 %v549_v22  ;;  %v550_v26 = vcvt.f32.s32 %v547_v23 }
 0xcdd   :  { %v552_v25 = vshll.u32 %v551_v24, 16 }
 0xcdf   :  { %v553_v27 = vadd.s32 %v552_v25, %v550_v26 }
 0xce1   :  { %vm554_vm7 = vcmp.ge.s32.totalorder %v553_v27, 25 }
 0xce2   :  { %v555_v28 = vsel %vm554_vm7, %v535_v13, %v534_v9 }
 0xce3   :  { %v556_v29 = vor.u32 128, %v555_v28 }
 0xce5   :  { %v557_v30 = vxor.u32 2147483648, %v556_v29 }
 0xce7   :  { %vm558_vm8 = vcmp.ge.s32.totalorder %v858_v10, %v557_v30  ;;  %vm559_vm9 = vcmp.ge.s32.totalorder %v860_v11, %v557_v30 }
 0xce8   :  { %v560_v31 = vsel %vm558_vm8, 1, %v835_v12  ;;  %v561_v32 = vsel %vm559_vm9, 1, %v835_v12 }
 0xce9   :  { %v562_v33 = vadd.s32 %v561_v32, %v560_v31 }
 0xceb   :  { %v564_v34 = vshrl.u32 %v562_v33, 16  ;;  %v563_v35 = vand.u32 65535, %v562_v33 }
 0xced   :  { %v566_v36 = vcvt.s32.f32 %v564_v34  ;;  %v565_v37 = vcvt.s32.f32 %v563_v35 }
 0xcef   :  { %569 = vadd.xlane.f32.xlu0 %v566_v36  ;;  %567 = vadd.xlane.f32.xlu1 %v565_v37 }
 0xd62   :  { %v570_v38 = vpop.xlane.xlu0 %569  ;;  %v568_v39 = vpop.xlane.xlu1 %567 }
 0xd63   :  { %v572_v40 = vcvt.f32.s32 %v570_v38  ;;  %v571_v42 = vcvt.f32.s32 %v568_v39 }
 0xd65   :  { %v573_v41 = vshll.u32 %v572_v40, 16 }
 0xd67   :  { %v574_v43 = vadd.s32 %v573_v41, %v571_v42 }
 0xd69   :  { %vm575_vm10 = vcmp.ge.s32.totalorder %v574_v43, 25 }
 0xd6a   :  { %v576_v44 = vsel %vm575_vm10, %v556_v29, %v555_v28 }
 0xd6b   :  { %v577_v45 = vor.u32 64, %v576_v44 }
 0xd6d   :  { %v578_v46 = vxor.u32 2147483648, %v577_v45 }
 0xd6f   :  { %vm579_vm11 = vcmp.ge.s32.totalorder %v858_v10, %v578_v46  ;;  %vm580_vm12 = vcmp.ge.s32.totalorder %v860_v11, %v578_v46 }
 0xd70   :  { %v581_v47 = vsel %vm579_vm11, 1, %v835_v12  ;;  %v582_v48 = vsel %vm580_vm12, 1, %v835_v12 }
 0xd71   :  { %v583_v49 = vadd.s32 %v582_v48, %v581_v47 }
 0xd73   :  { %v585_v50 = vshrl.u32 %v583_v49, 16  ;;  %v584_v51 = vand.u32 65535, %v583_v49 }
 0xd75   :  { %v587_v52 = vcvt.s32.f32 %v585_v50  ;;  %v586_v53 = vcvt.s32.f32 %v584_v51 }
 0xd77   :  { %590 = vadd.xlane.f32.xlu2 %v587_v52  ;;  %588 = vadd.xlane.f32.xlu0 %v586_v53 }
 0xdea   :  { %v591_v54 = vpop.xlane.xlu2 %590  ;;  %v589_v55 = vpop.xlane.xlu0 %588 }
 0xdeb   :  { %v593_v56 = vcvt.f32.s32 %v591_v54  ;;  %v592_v58 = vcvt.f32.s32 %v589_v55 }
 0xded   :  { %v594_v57 = vshll.u32 %v593_v56, 16 }
 0xdef   :  { %v595_v59 = vadd.s32 %v594_v57, %v592_v58 }
 0xdf1   :  { %vm596_vm13 = vcmp.ge.s32.totalorder %v595_v59, 25 }
 0xdf2   :  { %v597_v60 = vsel %vm596_vm13, %v577_v45, %v576_v44 }
 0xdf3   :  { %v598_v61 = vor.u32 32, %v597_v60 }
 0xdf5   :  { %v599_v62 = vxor.u32 2147483648, %v598_v61 }
 0xdf7   :  { %vm600_vm14 = vcmp.ge.s32.totalorder %v858_v10, %v599_v62  ;;  %vm601_vm15 = vcmp.ge.s32.totalorder %v860_v11, %v599_v62 }
 0xdf8   :  { %v602_v63 = vsel %vm600_vm14, 1, %v835_v12  ;;  %v603_v0 = vsel %vm601_vm15, 1, %v835_v12 }
 0xdf9   :  { %v604_v1 = vadd.s32 %v603_v0, %v602_v63 }
 0xdfb   :  { %v606_v2 = vshrl.u32 %v604_v1, 16  ;;  %v605_v3 = vand.u32 65535, %v604_v1 }
 0xdfd   :  { %v608_v4 = vcvt.s32.f32 %v606_v2  ;;  %v607_v5 = vcvt.s32.f32 %v605_v3 }
 0xdff   :  { %611 = vadd.xlane.f32.xlu1 %v608_v4  ;;  %609 = vadd.xlane.f32.xlu2 %v607_v5 }
 0xe72   :  { %v612_v6 = vpop.xlane.xlu1 %611  ;;  %v610_v7 = vpop.xlane.xlu2 %609 }
 0xe73   :  { %v614_v8 = vcvt.f32.s32 %v612_v6  ;;  %v613_v13 = vcvt.f32.s32 %v610_v7 }
 0xe75   :  { %v615_v9 = vshll.u32 %v614_v8, 16 }
 0xe77   :  { %v616_v14 = vadd.s32 %v615_v9, %v613_v13 }
 0xe79   :  { %vm617_vm0 = vcmp.ge.s32.totalorder %v616_v14, 25 }
 0xe7a   :  { %v618_v15 = vsel %vm617_vm0, %v598_v61, %v597_v60 }
 0xe7b   :  { %v619_v16 = vor.u32 16, %v618_v15 }
 0xe7d   :  { %v620_v17 = vxor.u32 2147483648, %v619_v16 }
 0xe7f   :  { %vm621_vm1 = vcmp.ge.s32.totalorder %v858_v10, %v620_v17  ;;  %vm622_vm2 = vcmp.ge.s32.totalorder %v860_v11, %v620_v17 }
 0xe80   :  { %v623_v18 = vsel %vm621_vm1, 1, %v835_v12  ;;  %v624_v19 = vsel %vm622_vm2, 1, %v835_v12 }
 0xe81   :  { %v625_v20 = vadd.s32 %v624_v19, %v623_v18 }
 0xe83   :  { %v627_v21 = vshrl.u32 %v625_v20, 16  ;;  %v626_v22 = vand.u32 65535, %v625_v20 }
 0xe85   :  { %v629_v23 = vcvt.s32.f32 %v627_v21  ;;  %v628_v24 = vcvt.s32.f32 %v626_v22 }
 0xe87   :  { %632 = vadd.xlane.f32.xlu0 %v629_v23  ;;  %630 = vadd.xlane.f32.xlu1 %v628_v24 }
 0xefa   :  { %v633_v25 = vpop.xlane.xlu0 %632  ;;  %v631_v26 = vpop.xlane.xlu1 %630 }
 0xefb   :  { %v635_v27 = vcvt.f32.s32 %v633_v25  ;;  %v634_v29 = vcvt.f32.s32 %v631_v26 }
 0xefd   :  { %v636_v28 = vshll.u32 %v635_v27, 16 }
 0xeff   :  { %v637_v30 = vadd.s32 %v636_v28, %v634_v29 }
 0xf01   :  { %vm638_vm3 = vcmp.ge.s32.totalorder %v637_v30, 25 }
 0xf02   :  { %v639_v31 = vsel %vm638_vm3, %v619_v16, %v618_v15 }
 0xf03   :  { %v640_v32 = vor.u32 8, %v639_v31 }
 0xf05   :  { %v641_v33 = vxor.u32 2147483648, %v640_v32 }
 0xf07   :  { %vm642_vm4 = vcmp.ge.s32.totalorder %v858_v10, %v641_v33  ;;  %vm643_vm5 = vcmp.ge.s32.totalorder %v860_v11, %v641_v33 }
 0xf08   :  { %v644_v34 = vsel %vm642_vm4, 1, %v835_v12  ;;  %v645_v35 = vsel %vm643_vm5, 1, %v835_v12 }
 0xf09   :  { %v646_v36 = vadd.s32 %v645_v35, %v644_v34 }
 0xf0b   :  { %v648_v37 = vshrl.u32 %v646_v36, 16  ;;  %v647_v38 = vand.u32 65535, %v646_v36 }
 0xf0d   :  { %v650_v39 = vcvt.s32.f32 %v648_v37  ;;  %v649_v40 = vcvt.s32.f32 %v647_v38  ;;  %v754_v37 = vld [vmem:[#allocation2 + $0x8] sm:$0xff] }
 0xf0f   :  { %653 = vadd.xlane.f32.xlu2 %v650_v39  ;;  %651 = vadd.xlane.f32.xlu0 %v649_v40 }
 0xf82   :  { %v654_v41 = vpop.xlane.xlu2 %653  ;;  %v652_v42 = vpop.xlane.xlu0 %651 }
 0xf83   :  { %v656_v43 = vcvt.f32.s32 %v654_v41  ;;  %v655_v45 = vcvt.f32.s32 %v652_v42 }
 0xf85   :  { %v657_v44 = vshll.u32 %v656_v43, 16 }
 0xf87   :  { %v658_v46 = vadd.s32 %v657_v44, %v655_v45 }
 0xf89   :  { %vm659_vm6 = vcmp.ge.s32.totalorder %v658_v46, 25 }
 0xf8a   :  { %v660_v47 = vsel %vm659_vm6, %v640_v32, %v639_v31 }
 0xf8b   :  { %v661_v48 = vor.u32 4, %v660_v47 }
 0xf8d   :  { %v662_v49 = vxor.u32 2147483648, %v661_v48 }
 0xf8f   :  { %vm663_vm7 = vcmp.ge.s32.totalorder %v858_v10, %v662_v49  ;;  %vm664_vm8 = vcmp.ge.s32.totalorder %v860_v11, %v662_v49 }
 0xf90   :  { %v665_v50 = vsel %vm663_vm7, 1, %v835_v12  ;;  %v666_v51 = vsel %vm664_vm8, 1, %v835_v12 }
 0xf91   :  { %v667_v52 = vadd.s32 %v666_v51, %v665_v50 }
 0xf93   :  { %v669_v53 = vshrl.u32 %v667_v52, 16  ;;  %v668_v54 = vand.u32 65535, %v667_v52 }
 0xf95   :  { %v671_v55 = vcvt.s32.f32 %v669_v53  ;;  %v670_v56 = vcvt.s32.f32 %v668_v54 }
 0xf97   :  { %674 = vadd.xlane.f32.xlu1 %v671_v55  ;;  %672 = vadd.xlane.f32.xlu2 %v670_v56 }
0x100a   :  { %v675_v57 = vpop.xlane.xlu1 %674  ;;  %v673_v58 = vpop.xlane.xlu2 %672 }
0x100b   :  { %v677_v59 = vcvt.f32.s32 %v675_v57  ;;  %v676_v61 = vcvt.f32.s32 %v673_v58 }
0x100d   :  { %v678_v60 = vshll.u32 %v677_v59, 16 }
0x100f   :  { %v679_v62 = vadd.s32 %v678_v60, %v676_v61 }
0x1011   :  { %vm680_vm9 = vcmp.ge.s32.totalorder %v679_v62, 25 }
0x1012   :  { %v681_v63 = vsel %vm680_vm9, %v661_v48, %v660_v47 }
0x1013   :  { %v682_v0 = vor.u32 2, %v681_v63 }
0x1015   :  { %v683_v1 = vxor.u32 2147483648, %v682_v0 }
0x1017   :  { %vm684_vm10 = vcmp.ge.s32.totalorder %v858_v10, %v683_v1  ;;  %vm685_vm11 = vcmp.ge.s32.totalorder %v860_v11, %v683_v1 }
0x1018   :  { %v686_v2 = vsel %vm684_vm10, 1, %v835_v12  ;;  %v687_v3 = vsel %vm685_vm11, 1, %v835_v12 }
0x1019   :  { %v688_v4 = vadd.s32 %v687_v3, %v686_v2 }
0x101b   :  { %v690_v5 = vshrl.u32 %v688_v4, 16  ;;  %v689_v6 = vand.u32 65535, %v688_v4 }
0x101d   :  { %v692_v7 = vcvt.s32.f32 %v690_v5  ;;  %v691_v8 = vcvt.s32.f32 %v689_v6 }
0x101f   :  { %695 = vadd.xlane.f32.xlu0 %v692_v7  ;;  %693 = vadd.xlane.f32.xlu1 %v691_v8 }
0x1092   :  { %v696_v9 = vpop.xlane.xlu0 %695  ;;  %v694_v13 = vpop.xlane.xlu1 %693 }
0x1093   :  { %v698_v14 = vcvt.f32.s32 %v696_v9  ;;  %v697_v16 = vcvt.f32.s32 %v694_v13 }
0x1095   :  { %v699_v15 = vshll.u32 %v698_v14, 16 }
0x1097   :  { %v700_v17 = vadd.s32 %v699_v15, %v697_v16 }
0x1099   :  { %vm701_vm12 = vcmp.ge.s32.totalorder %v700_v17, 25 }
0x109a   :  { %v702_v18 = vsel %vm701_vm12, %v682_v0, %v681_v63 }
0x109b   :  { %v703_v19 = vor.u32 1, %v702_v18 }
0x109d   :  { %v704_v20 = vxor.u32 2147483648, %v703_v19 }
0x109f   :  { %vm705_vm13 = vcmp.ge.s32.totalorder %v858_v10, %v704_v20  ;;  %vm706_vm14 = vcmp.ge.s32.totalorder %v860_v11, %v704_v20 }
0x10a0   :  { %v707_v21 = vsel %vm705_vm13, 1, %v835_v12  ;;  %v708_v22 = vsel %vm706_vm14, 1, %v835_v12  ;;  %v753_v12 = vld [vmem:[#allocation2] sm:$0xff] }
0x10a1   :  { %v709_v23 = vadd.s32 %v708_v22, %v707_v21 }
0x10a3   :  { %v711_v24 = vshrl.u32 %v709_v23, 16  ;;  %v710_v25 = vand.u32 65535, %v709_v23 }
0x10a5   :  { %v713_v26 = vcvt.s32.f32 %v711_v24  ;;  %v712_v27 = vcvt.s32.f32 %v710_v25 }
0x10a7   :  { %716 = vadd.xlane.f32.xlu2 %v713_v26  ;;  %714 = vadd.xlane.f32.xlu0 %v712_v27 }
0x111a   :  { %v717_v28 = vpop.xlane.xlu2 %716  ;;  %v715_v29 = vpop.xlane.xlu0 %714 }
0x111b   :  { %v719_v30 = vcvt.f32.s32 %v717_v28  ;;  %v718_v32 = vcvt.f32.s32 %v715_v29 }
0x111d   :  { %v720_v31 = vshll.u32 %v719_v30, 16 }
0x111f   :  { %v721_v33 = vadd.s32 %v720_v31, %v718_v32 }
0x1121   :  { %vm722_vm15 = vcmp.ge.s32.totalorder %v721_v33, 25 }
0x1122   :  { %v723_v34 = vsel %vm722_vm15, %v703_v19, %v702_v18 }
0x1123   :  { %v724_v35 = vxor.u32 2147483648, %v723_v34 }
0x1125   :  { %vm725_vm0 = vcmp.ge.s32.totalorder %v858_v10, %v724_v35  ;;  %vm726_vm1 = vcmp.ge.s32.totalorder %v860_v11, %v724_v35 }
0x1126   :  { %v727_v36 = vsel %vm725_vm0, %v753_v12, 0.0  ;;  %v728_v38 = vsel %vm726_vm1, %v754_v37, 0.0 }
0x1127   :  { %729 = vst [vmem:[#allocation7] sm:$0xff] %v727_v36 }
0x1128   :  { %730 = vst [vmem:[#allocation7 + $0x8] sm:$0xff] %v728_v38 }
0x1129   :  { %741 = dma.vmem_to_hbm [thread:$0]  %s737_s1, 256, %s739_s21, [#allocation4]  }
0x112a   :  { %831 = dma.done.wait [#allocation4], 256  }
0x112b   :  { %832 = vsyncadd [#allocation4], 4294967040 }
0x112c   :  { %746 = vsyncpa [#allocation3], 1 }
0x112d   :  { %747 = vsyncpa [#allocation6], 1 }
0x112e   :  { %748 = vsyncpa [#allocation4], 1 }

</bundles_post_ra>
